<compile_context>
chip_gen: v7x
topology: tpu7x:2x2x1
jax: 0.10.0
libtpu: 0.0.40
codegen_flags: <defaults>
</compile_context>

<pallas_src>
import jax
import jax.numpy as jnp
from jax.experimental import pallas as pl
from jax.experimental.pallas import tpu as pltpu


LANE = 128      # hidden dims are zero-padded up to multiples of this
SUBLANE = 8
MAX_BM = 512    # max batch rows per grid step (VMEM is a non-issue here)


def _round_up(x, m):
    return ((x + m - 1) // m) * m


def _pick_bm(batch):
    """Batch rows per grid step.

    Large tiles amortize per-step pipeline overhead; for batches that fit in
    <= 2*MAX_BM rows we still split into 2 steps so the (parallel) batch axis
    can be sharded across v7x's two TensorCores.
    """
    if batch <= SUBLANE:
        return SUBLANE
    if batch <= 2 * MAX_BM:
        return _round_up(-(-batch // 2), SUBLANE)   # cdiv(batch, 2), sublane-aligned
    return MAX_BM


def critic_kernel(s_ref, a_ref, w1_ref, b1_ref, w2s_ref, w2a_ref, b2_ref,
                  w3_ref, b3_ref, o_ref):
    """Fused critic forward on one (BM, ...) batch tile.

    All weight/bias refs are lane-padded and VMEM-resident across grid steps.
    """
    s = s_ref[...].astype(jnp.bfloat16)
    a = a_ref[...].astype(jnp.bfloat16)

    # fc1 + ReLU: bf16 MXU operands, f32 accumulate, f32 epilogue.
    h1 = jnp.dot(s, w1_ref[...], preferred_element_type=jnp.float32)
    h1 = jnp.maximum(h1 + b1_ref[...], 0.0)

    # fc2 over the implicit concat:  cat([h1, a], 1) @ W2 == h1 @ W2s + a @ W2a.
    # (If profiling at large BM shows the MXU saturating on v6e/v7x, the tiny
    #  K=action_dim term could move to an unrolled VPU FMA instead of a dot.)
    h2 = jnp.dot(h1.astype(jnp.bfloat16), w2s_ref[...],
                 preferred_element_type=jnp.float32)
    h2 = h2 + jnp.dot(a, w2a_ref[...], preferred_element_type=jnp.float32)
    h2 = jnp.maximum(h2 + b2_ref[...], 0.0)

    # fc3 head (out_features=1): VPU multiply + XLU lane reduction instead of
    # an MXU pass with a single live output lane.
    q = jnp.sum(h2 * w3_ref[...], axis=-1, keepdims=True)
    o_ref[...] = (q + b3_ref[...]).astype(o_ref.dtype)


@jax.jit
def critic_forward(state, action, w1, b1, w2s, w2a, b2, w3_row, b3):
    batch, state_dim = state.shape
    action_dim = action.shape[1]

    bm = _pick_bm(batch)
    grid = (pl.cdiv(batch, bm),)   # partial last block handled/masked by Pallas

    def tile_spec(cols):
        # Batch-tiled operand: one (bm, cols) slab per grid step, pipelined.
        return pl.BlockSpec((bm, cols), lambda i: (i, 0))

    def resident_spec(shape):
        # Full-array block with a constant index_map: DMA'd once, then stays
        # resident in VMEM across every grid step (Pallas skips the re-fetch
        # when consecutive steps map to the same block index).
        return pl.BlockSpec(shape, lambda i: (0, 0))

    return pl.pallas_call(
        critic_kernel,
        out_shape=jax.ShapeDtypeStruct((batch, 1), jnp.float32),
        grid=grid,
        in_specs=[
            tile_spec(state_dim),
            tile_spec(action_dim),
            resident_spec(w1.shape), resident_spec(b1.shape),
            resident_spec(w2s.shape), resident_spec(w2a.shape),
            resident_spec(b2.shape),
            resident_spec(w3_row.shape), resident_spec(b3.shape),
        ],
        out_specs=tile_spec(1),
        compiler_params=pltpu.CompilerParams(
            dimension_semantics=("parallel",)),  # batch axis -> both TCs on v7x
    )(state, action, w1, b1, w2s, w2a, b2, w3_row, b3)


def init_linear_params(key, in_features, out_features):
    """PyTorch nn.Linear default init U[-1/sqrt(fan_in), 1/sqrt(fan_in)].

    Weight returned in (in_features, out_features) layout (transposed vs
    torch), bias as a (1, out_features) row; both f32 here — precision/layout
    conversion happens once in prepare_critic_params.
    """
    k_w, k_b = jax.random.split(key)
    bound = float(in_features) ** -0.5
    w = jax.random.uniform(k_w, (in_features, out_features), jnp.float32,
                           minval=-bound, maxval=bound)
    b = jax.random.uniform(k_b, (1, out_features), jnp.float32,
                           minval=-bound, maxval=bound)
    return w, b


def prepare_critic_params(w1, b1, w2, b2, w3, b3, hidden_1):
    """One-time weight prep (outside the hot path):
      * split W2 into its state/action halves (folds torch.cat away),
      * zero-pad hidden dims to lane multiples (exact through matmul+ReLU),
      * bf16 for MXU operands (W1, W2s, W2a); f32 for the fc3 VPU row + biases.
    """
    h1 = w1.shape[1]
    h2 = w2.shape[1]
    h1p = _round_up(h1, LANE)
    h2p = _round_up(h2, LANE)

    w1p = jnp.zeros((w1.shape[0], h1p), jnp.float32).at[:, :h1].set(w1)
    b1p = jnp.zeros((1, h1p), jnp.float32).at[:, :h1].set(b1)

    w2s, w2a = w2[:hidden_1], w2[hidden_1:]
    w2sp = jnp.zeros((h1p, h2p), jnp.float32).at[:hidden_1, :h2].set(w2s)
    w2ap = jnp.zeros((w2a.shape[0], h2p), jnp.float32).at[:, :h2].set(w2a)
    b2p = jnp.zeros((1, h2p), jnp.float32).at[:, :h2].set(b2)

    w3row = jnp.zeros((1, h2p), jnp.float32).at[:, :h2].set(w3[:, 0][None, :])

    return (w1p.astype(jnp.bfloat16), b1p,
            w2sp.astype(jnp.bfloat16), w2ap.astype(jnp.bfloat16), b2p,
            w3row, b3)


if __name__ == "__main__":
    # Small shapes consistent with the module (hidden sizes = __init__ defaults).
    # batch=300 exercises a 2-step grid with a masked partial last block.
    batch = 300
    state_dim = 16
    action_dim = 8
    hidden_1 = 400
    hidden_2 = 200

    root = jax.random.PRNGKey(0)
    k_s, k_a, k1, k2, k3 = jax.random.split(root, 5)

    state = jax.random.normal(k_s, (batch, state_dim), jnp.float32)
    action = jax.random.normal(k_a, (batch, action_dim), jnp.float32)

    w1, b1 = init_linear_params(k1, state_dim, hidden_1)
    w2, b2 = init_linear_params(k2, hidden_1 + action_dim, hidden_2)
    w3, b3 = init_linear_params(k3, hidden_2, 1)

    params = prepare_critic_params(w1, b1, w2, b2, w3, b3, hidden_1)

    out = critic_forward(state, action, *params)
    out = jax.block_until_ready(out)

    # Pure-JAX reference with the ORIGINAL (unpadded, concatenated) weights and
    # the same precision choices as the kernel (bf16 matmul operands, f32
    # accumulate / epilogue, f32 head).  The padded shapes never appear here,
    # so this also verifies the zero-padding and the concat-fold are exact.
    f32 = jnp.float32
    w1b, w2b = w1.astype(jnp.bfloat16), w2.astype(jnp.bfloat16)
    h1_ref = jnp.maximum(
        jnp.dot(state.astype(jnp.bfloat16), w1b, preferred_element_type=f32) + b1, 0.0)
    x_ref = jnp.concatenate([h1_ref, action], axis=1)
    h2_ref = jnp.maximum(
        jnp.dot(x_ref.astype(jnp.bfloat16), w2b, preferred_element_type=f32) + b2, 0.0)
    ref = jnp.dot(h2_ref, w3) + b3

    assert out.shape == (batch, 1)
    err = float(jnp.max(jnp.abs(out - ref)))
    assert jnp.allclose(out, ref, atol=5e-3, rtol=5e-3), err

    print("KERNEL_OK")
</pallas_src>

<mosaic_0001>
module attributes {stable_mosaic.version = 11 : i64} {
  func.func @critic_kernel(%arg0: i32, %arg1: memref<152x16xf32, #tpu.memory_space<vmem>>, %arg2: memref<152x8xf32, #tpu.memory_space<vmem>>, %arg3: memref<16x512xbf16, #tpu.memory_space<vmem>>, %arg4: memref<1x512xf32, #tpu.memory_space<vmem>>, %arg5: memref<512x256xbf16, #tpu.memory_space<vmem>>, %arg6: memref<8x256xbf16, #tpu.memory_space<vmem>>, %arg7: memref<1x256xf32, #tpu.memory_space<vmem>>, %arg8: memref<1x256xf32, #tpu.memory_space<vmem>>, %arg9: memref<1x1xf32, #tpu.memory_space<vmem>>, %arg10: memref<152x1xf32, #tpu.memory_space<vmem>>) attributes {dimension_semantics = [#tpu.dimension_semantics<parallel>], iteration_bounds = array<i64: 2>, scalar_prefetch = 0 : i64, scratch_operands = 0 : i64, tpu.core_type = #tpu.core_type<tc>, window_params = [{transform_indices = @transform_0, window_bounds = array<i64: 152, 16>}, {transform_indices = @transform_1, window_bounds = array<i64: 152, 8>}, {pipeline_mode = #tpu.pipeline_mode<synchronous>, transform_indices = @transform_2, window_bounds = array<i64: 16, 512>}, {pipeline_mode = #tpu.pipeline_mode<synchronous>, transform_indices = @transform_3, window_bounds = array<i64: 1, 512>}, {pipeline_mode = #tpu.pipeline_mode<synchronous>, transform_indices = @transform_4, window_bounds = array<i64: 512, 256>}, {pipeline_mode = #tpu.pipeline_mode<synchronous>, transform_indices = @transform_5, window_bounds = array<i64: 8, 256>}, {pipeline_mode = #tpu.pipeline_mode<synchronous>, transform_indices = @transform_6, window_bounds = array<i64: 1, 256>}, {pipeline_mode = #tpu.pipeline_mode<synchronous>, transform_indices = @transform_7, window_bounds = array<i64: 1, 256>}, {pipeline_mode = #tpu.pipeline_mode<synchronous>, transform_indices = @transform_8, window_bounds = array<i64: 1, 1>}, {transform_indices = @transform_9, window_bounds = array<i64: 152, 1>}]} {
    %c0 = arith.constant 0 : index
    %c0_0 = arith.constant 0 : index
    %0 = vector.load %arg1[%c0, %c0_0] : memref<152x16xf32, #tpu.memory_space<vmem>>, vector<152x16xf32>
    %1 = arith.truncf %0 : vector<152x16xf32> to vector<152x16xbf16>
    %c0_1 = arith.constant 0 : index
    %c0_2 = arith.constant 0 : index
    %2 = vector.load %arg2[%c0_1, %c0_2] : memref<152x8xf32, #tpu.memory_space<vmem>>, vector<152x8xf32>
    %3 = arith.truncf %2 : vector<152x8xf32> to vector<152x8xbf16>
    %c0_3 = arith.constant 0 : index
    %c0_4 = arith.constant 0 : index
    %4 = vector.load %arg3[%c0_3, %c0_4] : memref<16x512xbf16, #tpu.memory_space<vmem>>, vector<16x512xbf16>
    %cst = arith.constant dense<0.000000e+00> : vector<152x512xf32>
    %5 = tpu.matmul %1, %4, %cst {dimension_numbers = #tpu.dot_dimension_numbers<[1], [0], [0], [1], [0, 0, 1, 1], [], []>} : vector<152x16xbf16>, vector<16x512xbf16>, vector<152x512xf32> -> vector<152x512xf32>
    %c0_5 = arith.constant 0 : index
    %c0_6 = arith.constant 0 : index
    %6 = vector.load %arg4[%c0_5, %c0_6] : memref<1x512xf32, #tpu.memory_space<vmem>>, vector<1x512xf32>
    %7 = vector.broadcast %6 : vector<1x512xf32> to vector<152x512xf32>
    %8 = arith.addf %5, %7 : vector<152x512xf32>
    %cst_7 = arith.constant 0.000000e+00 : f32
    %9 = vector.broadcast %cst_7 : f32 to vector<152x512xf32>
    %10 = arith.maximumf %8, %9 : vector<152x512xf32>
    %11 = arith.truncf %10 : vector<152x512xf32> to vector<152x512xbf16>
    %c0_8 = arith.constant 0 : index
    %c0_9 = arith.constant 0 : index
    %12 = vector.load %arg5[%c0_8, %c0_9] : memref<512x256xbf16, #tpu.memory_space<vmem>>, vector<512x256xbf16>
    %cst_10 = arith.constant dense<0.000000e+00> : vector<152x256xf32>
    %13 = tpu.matmul %11, %12, %cst_10 {dimension_numbers = #tpu.dot_dimension_numbers<[1], [0], [0], [1], [0, 0, 1, 1], [], []>} : vector<152x512xbf16>, vector<512x256xbf16>, vector<152x256xf32> -> vector<152x256xf32>
    %c0_11 = arith.constant 0 : index
    %c0_12 = arith.constant 0 : index
    %14 = vector.load %arg6[%c0_11, %c0_12] : memref<8x256xbf16, #tpu.memory_space<vmem>>, vector<8x256xbf16>
    %cst_13 = arith.constant dense<0.000000e+00> : vector<152x256xf32>
    %15 = tpu.matmul %3, %14, %cst_13 {dimension_numbers = #tpu.dot_dimension_numbers<[1], [0], [0], [1], [0, 0, 1, 1], [], []>} : vector<152x8xbf16>, vector<8x256xbf16>, vector<152x256xf32> -> vector<152x256xf32>
    %16 = arith.addf %13, %15 : vector<152x256xf32>
    %c0_14 = arith.constant 0 : index
    %c0_15 = arith.constant 0 : index
    %17 = vector.load %arg7[%c0_14, %c0_15] : memref<1x256xf32, #tpu.memory_space<vmem>>, vector<1x256xf32>
    %18 = vector.broadcast %17 : vector<1x256xf32> to vector<152x256xf32>
    %19 = arith.addf %16, %18 : vector<152x256xf32>
    %cst_16 = arith.constant 0.000000e+00 : f32
    %20 = vector.broadcast %cst_16 : f32 to vector<152x256xf32>
    %21 = arith.maximumf %19, %20 : vector<152x256xf32>
    %c0_17 = arith.constant 0 : index
    %c0_18 = arith.constant 0 : index
    %22 = vector.load %arg8[%c0_17, %c0_18] : memref<1x256xf32, #tpu.memory_space<vmem>>, vector<1x256xf32>
    %23 = vector.broadcast %22 : vector<1x256xf32> to vector<152x256xf32>
    %24 = arith.mulf %21, %23 : vector<152x256xf32>
    %cst_19 = arith.constant dense<0.000000e+00> : vector<152xf32>
    %25 = vector.multi_reduction <add>, %24, %cst_19 [1] : vector<152x256xf32> to vector<152xf32>
    %26 = vector.shape_cast %25 : vector<152xf32> to vector<152x1xf32>
    %c0_20 = arith.constant 0 : index
    %c0_21 = arith.constant 0 : index
    %27 = vector.load %arg9[%c0_20, %c0_21] : memref<1x1xf32, #tpu.memory_space<vmem>>, vector<1x1xf32>
    %28 = vector.broadcast %27 : vector<1x1xf32> to vector<152x1xf32>
    %29 = arith.addf %26, %28 : vector<152x1xf32>
    %c0_22 = arith.constant 0 : index
    %c0_23 = arith.constant 0 : index
    %30 = vector.load %arg10[%c0_22, %c0_23] : memref<152x1xf32, #tpu.memory_space<vmem>>, vector<152x1xf32>
    tpu.vector_store %arg10[%c0_22, %c0_23], %29 {strides = array<i32>} : memref<152x1xf32, #tpu.memory_space<vmem>>, vector<152x1xf32>,
    return
  }
  func.func @transform_0(%arg0: i32) -> (i32, i32) {
    %c0_i32 = arith.constant 0 : i32
    %c0_i32_0 = arith.constant 0 : i32
    return %arg0, %c0_i32 : i32, i32
  }
  func.func @transform_1(%arg0: i32) -> (i32, i32) {
    %c0_i32 = arith.constant 0 : i32
    %c0_i32_0 = arith.constant 0 : i32
    return %arg0, %c0_i32 : i32, i32
  }
  func.func @transform_2(%arg0: i32) -> (i32, i32) {
    %c0_i32 = arith.constant 0 : i32
    %c0_i32_0 = arith.constant 0 : i32
    %c0_i32_1 = arith.constant 0 : i32
    return %c0_i32, %c0_i32_0 : i32, i32
  }
  func.func @transform_3(%arg0: i32) -> (i32, i32) {
    %c0_i32 = arith.constant 0 : i32
    %c0_i32_0 = arith.constant 0 : i32
    %c0_i32_1 = arith.constant 0 : i32
    return %c0_i32, %c0_i32_0 : i32, i32
  }
  func.func @transform_4(%arg0: i32) -> (i32, i32) {
    %c0_i32 = arith.constant 0 : i32
    %c0_i32_0 = arith.constant 0 : i32
    %c0_i32_1 = arith.constant 0 : i32
    return %c0_i32, %c0_i32_0 : i32, i32
  }
  func.func @transform_5(%arg0: i32) -> (i32, i32) {
    %c0_i32 = arith.constant 0 : i32
    %c0_i32_0 = arith.constant 0 : i32
    %c0_i32_1 = arith.constant 0 : i32
    return %c0_i32, %c0_i32_0 : i32, i32
  }
  func.func @transform_6(%arg0: i32) -> (i32, i32) {
    %c0_i32 = arith.constant 0 : i32
    %c0_i32_0 = arith.constant 0 : i32
    %c0_i32_1 = arith.constant 0 : i32
    return %c0_i32, %c0_i32_0 : i32, i32
  }
  func.func @transform_7(%arg0: i32) -> (i32, i32) {
    %c0_i32 = arith.constant 0 : i32
    %c0_i32_0 = arith.constant 0 : i32
    %c0_i32_1 = arith.constant 0 : i32
    return %c0_i32, %c0_i32_0 : i32, i32
  }
  func.func @transform_8(%arg0: i32) -> (i32, i32) {
    %c0_i32 = arith.constant 0 : i32
    %c0_i32_0 = arith.constant 0 : i32
    %c0_i32_1 = arith.constant 0 : i32
    return %c0_i32, %c0_i32_0 : i32, i32
  }
  func.func @transform_9(%arg0: i32) -> (i32, i32) {
    %c0_i32 = arith.constant 0 : i32
    %c0_i32_0 = arith.constant 0 : i32
    return %arg0, %c0_i32 : i32, i32
  }
}

</mosaic_0001>

<bundles_post_ra>
// kernel: critic_forward.1
= control target key start
LH: loop header
LB: loop body
LE: loop exit
PB: predicated region body
PF: predicated region fallthrough
CT: control target
= control target key end

     0   :  { %s2395_s11 = smov 0   ;;  %s3192_s0 = inlined_call_operand.vmem [shape: f32[300,16], index: 0, kind: input, shape index: {}]   ;;  %s3193_s1 = inlined_call_operand.vmem [shape: f32[300,8], index: 1, kind: input, shape index: {}]   ;;  %s3194_s2 = inlined_call_operand.vmem [shape: bf16[16,512], index: 2, kind: input, shape index: {}]   ;;  %s3195_s3 = inlined_call_operand.vmem [shape: f32[1,512], index: 3, kind: input, shape index: {}]   ;;  %s3196_s4 = inlined_call_operand.vmem [shape: bf16[512,256], index: 4, kind: input, shape index: {}]   ;;  %s3197_s5 = inlined_call_operand.vmem [shape: bf16[8,256], index: 5, kind: input, shape index: {}]   ;;  %s3198_s6 = inlined_call_operand.vmem [shape: f32[1,256], index: 6, kind: input, shape index: {}]   ;;  %s3199_s7 = inlined_call_operand.vmem [shape: f32[1,256], index: 7, kind: input, shape index: {}]   ;;  %s3200_s8 = inlined_call_operand.<no memory space> [shape: f32[1,1], index: 8, kind: input, shape index: {}]   ;;  %s3201_s9 = inlined_call_operand.vmem [shape: f32[300,1], index: 9, kind: output, shape index: {}]  }
   0x1   :  { %v14_v0 = vstv %s3200_s8 }
   0x2   :  { %15 = vst [vmem:[#allocation2] sm:$0x1] %v14_v0 }
   0x3 LB: > { %s2004_s12 = sadd.s32 4294967295, %s2339_s11   ;;  %p2008_p0 = scmp.ge.s32.totalorder %s2339_s11, 1  ;;  %s2339_s11 = sphi %s2395_s11, %s21_s11  }
   0x4   : > { %p301_p1 = scmp.lt.s32.totalorder %s2339_s11, 3 }
   0x6   : > { %p302_p2 = pnand %p2008_p0, %p301_p1 }
   0x7   : > { %v2229_v1 = vld [vmem:[%s3194_s2 + $0x4] ss:$16 sps:$4 sm:$0xff] (!%p302_p2)   ;;  %s342_s8 = smul.u32 (!%p302_p2), 19, %s2004_s12  ;;  %v2231_v2 = vld [vmem:[%s3194_s2] ss:$16 sps:$4 sm:$0xff] (!%p302_p2)   ;;  %v2341_v3 = vmov (!%p302_p2), 0  }
   0x8   : > { %305 = sbr.rel (%p302_p2) target bundleno = 763 (0x2fb), region = 56  ;;  %528 = vmatprep.mubr.bf16.mxu1 (!%p302_p2), %v2341_v3  ;;  %1014 = vmatprep.mubr.bf16.mxu0 (!%p302_p2), %v2341_v3  ;;  %v2234_v4 = vld [vmem:[%s3194_s2 + $0xc] ss:$16 sps:$4 sm:$0xff] (!%p302_p2)   ;;  %v2232_v5 = vld [vmem:[%s3194_s2 + $0x8] ss:$16 sps:$4 sm:$0xff] (!%p302_p2)   ;;  %vm465_vm0 = vcmask (!%p302_p2), 130048  }
   0x9   : > { %496 = vmatprep.subr.bf16.mxu1 (!%p302_p2), %v2229_v1  ;;  %p343_p3 = scmp.lt.s32.totalorder (!%p302_p2), %s342_s8, 37  ;;  %v938_v14 = vld [vmem:[%s3197_s5] sm:$0xff] (!%p302_p2)  ;;  %vm975_vm1 = vcmask (!%p302_p2), 1043456   ;;  %vm944_vm2 = vcmask (!%p302_p2), 64512   ;;  %v2242_v34 = vld [vmem:[%s3196_s4 + $0x14] ss:$8 sps:$4 sm:$0xff] (!%p302_p2)  }
   0xa   : > { %497 = vmatpush1.bf16.msra.mxu1 (!%p302_p2), %v2231_v2  ;;  %v2037_v15 = vcombine.high (!%p302_p2), %v938_v14, %v938_v14  ;;  %v2036_v16 = vcombine.low (!%p302_p2), %v938_v14, %v938_v14  ;;  %v2237_v31 = vld [vmem:[%s3196_s4] ss:$8 sps:$4 sm:$0xff] (!%p302_p2)   ;;  %v2239_v33 = vld [vmem:[%s3196_s4 + $0x4] ss:$8 sps:$4 sm:$0xff] (!%p302_p2)   ;;  %v2240_v37 = vld [vmem:[%s3196_s4 + $0x10] ss:$8 sps:$4 sm:$0xff] (!%p302_p2)  }
   0xb   : > { %627 = vmatprep.subr.bf16.mxu1 (!%p302_p2), %v2234_v4  ;;  %v2245_v38 = vld [vmem:[%s3196_s4 + $0x24] ss:$8 sps:$4 sm:$0xff] (!%p302_p2)   ;;  %v2243_v41 = vld [vmem:[%s3196_s4 + $0x20] ss:$8 sps:$4 sm:$0xff] (!%p302_p2)   ;;  %v2248_v44 = vld [vmem:[%s3196_s4 + $0x34] ss:$8 sps:$4 sm:$0xff] (!%p302_p2)  }
   0xc   : > { %2038 = vmatprep.subr.msk.bf16.mxu0 (!%p302_p2), %vm975_vm1, %v2037_v15  ;;  %v977_v19 = vsel (!%p302_p2), %vm975_vm1, %v2036_v16, 0  ;;  %v2246_v47 = vld [vmem:[%s3196_s4 + $0x30] ss:$8 sps:$4 sm:$0xff] (!%p302_p2)   ;;  %v2251_v48 = vld [vmem:[%s3196_s4 + $0x44] ss:$8 sps:$4 sm:$0xff] (!%p302_p2)   ;;  %vm1916_vm3 = vcmask (!%p302_p2), 7168  }
   0xd   : > { %983 = vmatpush1.bf16.msra.mxu0 (!%p302_p2), %v977_v19  ;;  %v2249_v51 = vld [vmem:[%s3196_s4 + $0x40] ss:$8 sps:$4 sm:$0xff] (!%p302_p2)   ;;  %v2254_v54 = vld [vmem:[%s3196_s4 + $0x54] ss:$8 sps:$4 sm:$0xff] (!%p302_p2)   ;;  %v2252_v57 = vld [vmem:[%s3196_s4 + $0x50] ss:$8 sps:$4 sm:$0xff] (!%p302_p2)  }
   0xe   : > { %1433 = vmatprep.subr.bf16.mxu0 (!%p302_p2), %v2239_v33  ;;  %v2257_v58 = vld [vmem:[%s3196_s4 + $0x64] ss:$8 sps:$4 sm:$0xff] (!%p302_p2)   ;;  %v2255_v61 = vld [vmem:[%s3196_s4 + $0x60] ss:$8 sps:$4 sm:$0xff] (!%p302_p2)   ;;  %v2260_v0 = vld [vmem:[%s3196_s4 + $0x74] ss:$8 sps:$4 sm:$0xff] (!%p302_p2)  }
   0xf   : > { %s3203_s8 = smov (!%p343_p3, %s342_s8), 37  ;;  %v2258_v4 = vld [vmem:[%s3196_s4 + $0x70] ss:$8 sps:$4 sm:$0xff]  }
  0x10   : > { %s2414_s19 = sshll.u32 %s3203_s8, 3  ;;  %v2264_v16 = vld [vmem:[%s3196_s4 + $0x90] ss:$8 sps:$4 sm:$0xff]  }
  0x11   : > { %s2420_s22 = scalar_lea.vmem %s3192_s0, %s2414_s19  ;;  %s2447_s29 = scalar_lea.vmem %s3193_s1, %s2414_s19 }
  0x12   : > { %v361_v6 = vld [vmem:[%s2420_s22] sm:$0xff]  ;;  %v362_v7 = vld [vmem:[%s2420_s22 + $0x8] sm:$0xff]  ;;  %v363_v9 = vld [vmem:[%s2420_s22 + $0x10] sm:$0xff]  ;;  %s3149_s10 = scalar_lea.vmem %s3201_s9, %s2414_s19 }
  0x13   : > { %v2427_v8 = vpack.c.bf16 %v362_v7, %v361_v6  ;;  %v364_v10 = vld [vmem:[%s2420_s22 + $0x18] sm:$0xff]  ;;  %v365_v12 = vld [vmem:[%s2420_s22 + $0x20] sm:$0xff]  ;;  %v366_v13 = vld [vmem:[%s2420_s22 + $0x28] sm:$0xff] }
  0x14   : > { %v2434_v11 = vpack.c.bf16 %v364_v10, %v363_v9  ;;  %v390_v17 = vld [vmem:[%s2447_s29] sm:$0xff]  ;;  %v391_v18 = vld [vmem:[%s2447_s29 + $0x8] sm:$0xff]  ;;  %v2452_v21 = vpack.c.bf16 %v366_v13, %v365_v12  ;;  %v367_v22 = vld [vmem:[%s2420_s22 + $0x30] sm:$0xff] }
  0x15   : > { %2016 = vmatmul.mubr.msk.bf16.vlgmr.msra.gmra.mrb[0].mxu1 %vm465_vm0, %v2427_v8  ;;  %v409_v20 = vpack.c.bf16 %v391_v18, %v390_v17  ;;  %v368_v23 = vld [vmem:[%s2420_s22 + $0x38] sm:$0xff]  ;;  %v392_v24 = vld [vmem:[%s2447_s29 + $0x10] sm:$0xff]  ;;  %v369_v28 = vld [vmem:[%s2420_s22 + $0x40] sm:$0xff] }
  0x16   : > { %628 = vmatpush1.bf16.msra.mxu1 %v2232_v5  ;;  %538 = vmatprep.mubr.bf16.mxu1 %v2341_v3  ;;  %v393_v25 = vld [vmem:[%s2447_s29 + $0x18] sm:$0xff]  ;;  %v2463_v27 = vpack.c.bf16 %v368_v23, %v367_v22  ;;  %v394_v29 = vld [vmem:[%s2447_s29 + $0x20] sm:$0xff]  ;;  %v395_v30 = vld [vmem:[%s2447_s29 + $0x28] sm:$0xff] }
  0x17   : > { %2039 = vmatmul.mubr.msk.bf16.vlgmr.msra.gmra.mrb[0].mxu0 %vm944_vm2, %v409_v20  ;;  %v410_v26 = vpack.c.bf16 %v393_v25, %v392_v24  ;;  %v370_v32 = vld [vmem:[%s2420_s22 + $0x48] sm:$0xff]  ;;  %v411_v35 = vpack.c.bf16 %v395_v30, %v394_v29  ;;  %v396_v39 = vld [vmem:[%s2447_s29 + $0x30] sm:$0xff]  ;;  %v397_v40 = vld [vmem:[%s2447_s29 + $0x38] sm:$0xff] }
  0x18   : > { %1024 = vmatprep.mubr.bf16.mxu0 %v2341_v3  ;;  %v2483_v36 = vpack.c.bf16 %v370_v32, %v369_v28  ;;  %1434 = vmatpush1.bf16.msra.mxu0 %v2237_v31  ;;  %v371_v42 = vld [vmem:[%s2420_s22 + $0x50] sm:$0xff]  ;;  %v372_v43 = vld [vmem:[%s2420_s22 + $0x58] sm:$0xff]  ;;  %v412_v45 = vpack.c.bf16 %v397_v40, %v396_v39  ;;  %v398_v49 = vld [vmem:[%s2447_s29 + $0x40] sm:$0xff] }
  0x19   : > { %1435 = vmatprep.subr.bf16.mxu0 %v2242_v34  ;;  %v2506_v46 = vpack.c.bf16 %v372_v43, %v371_v42  ;;  %v399_v50 = vld [vmem:[%s2447_s29 + $0x48] sm:$0xff]  ;;  %v373_v52 = vld [vmem:[%s2420_s22 + $0x60] sm:$0xff]  ;;  %v400_v59 = vld [vmem:[%s2447_s29 + $0x50] sm:$0xff] }
  0x1a   : > { %v374_v53 = vld [vmem:[%s2420_s22 + $0x68] sm:$0xff]  ;;  %v413_v55 = vpack.c.bf16 %v399_v50, %v398_v49  ;;  %v401_v60 = vld [vmem:[%s2447_s29 + $0x58] sm:$0xff]  ;;  %v375_v62 = vld [vmem:[%s2420_s22 + $0x70] sm:$0xff] }
  0x1b   : > { %v2529_v56 = vpack.c.bf16 %v374_v53, %v373_v52  ;;  %v376_v63 = vld [vmem:[%s2420_s22 + $0x78] sm:$0xff]  ;;  %v414_v1 = vpack.c.bf16 %v401_v60, %v400_v59  ;;  %v2263_v5 = vld [vmem:[%s3196_s4 + $0x84] ss:$8 sps:$4 sm:$0xff]   ;;  %v2261_v9 = vld [vmem:[%s3196_s4 + $0x80] ss:$8 sps:$4 sm:$0xff]  }
  0x1c   : > { %1436 = vmatpush1.bf16.msra.mxu0 %v2240_v37  ;;  %v2552_v2 = vpack.c.bf16 %v376_v63, %v375_v62  ;;  %v402_v6 = vld [vmem:[%s2447_s29 + $0x60] sm:$0xff]  ;;  %v403_v7 = vld [vmem:[%s2447_s29 + $0x68] sm:$0xff]  ;;  %v2266_v13 = vld [vmem:[%s3196_s4 + $0x94] ss:$8 sps:$4 sm:$0xff]  }
  0x1d   : > { %2017 = vmatmul.mubr.msk.bf16.gmra.mrb[4].mxu1 %vm465_vm0, %v2434_v11  ;;  %1437 = vmatprep.subr.bf16.mxu0 %v2245_v38  ;;  %v377_v10 = vld [vmem:[%s2420_s22 + $0x80] sm:$0xff]  ;;  %v378_v12 = vld [vmem:[%s2420_s22 + $0x88] sm:$0xff]  ;;  %v415_v14 = vpack.c.bf16 %v403_v7, %v402_v6  ;;  %v404_v18 = vld [vmem:[%s2447_s29 + $0x70] sm:$0xff] }
  0x1e   : > { %548 = vmatprep.mubr.bf16.mxu1 %v2341_v3  ;;  %v2575_v15 = vpack.c.bf16 %v378_v12, %v377_v10  ;;  %v2269_v17 = vld [vmem:[%s3196_s4 + $0xa4] ss:$8 sps:$4 sm:$0xff]   ;;  %v405_v19 = vld [vmem:[%s2447_s29 + $0x78] sm:$0xff]  ;;  %v2267_v20 = vld [vmem:[%s3196_s4 + $0xa0] ss:$8 sps:$4 sm:$0xff]  }
  0x1f   : > { %2040 = vmatmul.mubr.msk.bf16.gmra.mrb[4].mxu0 %vm944_vm2, %v410_v26  ;;  %v379_v22 = vld [vmem:[%s2420_s22 + $0x90] sm:$0xff]  ;;  %v416_v24 = vpack.c.bf16 %v405_v19, %v404_v18  ;;  %v2275_v28 = vld [vmem:[%s3196_s4 + $0xc4] ss:$8 sps:$4 sm:$0xff]   ;;  %v2273_v31 = vld [vmem:[%s3196_s4 + $0xc0] ss:$8 sps:$4 sm:$0xff]  }
  0x20   : > { %1034 = vmatprep.mubr.bf16.mxu0 %v2341_v3  ;;  %1438 = vmatpush1.bf16.msra.mxu0 %v2243_v41  ;;  %v2272_v23 = vld [vmem:[%s3196_s4 + $0xb4] ss:$8 sps:$4 sm:$0xff]   ;;  %v2597_v25 = vpack.c.bf16 %v379_v22, %v379_v22  ;;  %v2270_v26 = vld [vmem:[%s3196_s4 + $0xb0] ss:$8 sps:$4 sm:$0xff]   ;;  %v406_v29 = vld [vmem:[%s2447_s29 + $0x80] sm:$0xff] }
  0x21   : > { %1439 = vmatprep.subr.bf16.mxu0 %v2248_v44  ;;  %v407_v30 = vld [vmem:[%s2447_s29 + $0x88] sm:$0xff]  ;;  %v2278_v32 = vld [vmem:[%s3196_s4 + $0xd4] ss:$8 sps:$4 sm:$0xff]   ;;  %v2276_v34 = vld [vmem:[%s3196_s4 + $0xd0] ss:$8 sps:$4 sm:$0xff]  }
  0x22   : > { %v417_v33 = vpack.c.bf16 %v407_v30, %v406_v29  ;;  %v2281_v38 = vld [vmem:[%s3196_s4 + $0xe4] ss:$8 sps:$4 sm:$0xff]   ;;  %v2279_v39 = vld [vmem:[%s3196_s4 + $0xe0] ss:$8 sps:$4 sm:$0xff]   ;;  %v2282_v40 = vld [vmem:[%s3196_s4 + $0xf0] ss:$8 sps:$4 sm:$0xff]  }
  0x23   : > { %v2655_v41 = vld [vmem:[%s3196_s4 + $0x100] ss:$8 sps:$4 sm:$0xff]   ;;  %v2690_v43 = vld [vmem:[%s3196_s4 + $0x134] ss:$8 sps:$4 sm:$0xff]   ;;  %v2696_v44 = vld [vmem:[%s3196_s4 + $0x130] ss:$8 sps:$4 sm:$0xff]  }
  0x24   : > { %1440 = vmatpush1.bf16.msra.mxu0 %v2246_v47  ;;  %v2681_v42 = vld [vmem:[%s3196_s4 + $0x120] ss:$8 sps:$4 sm:$0xff]   ;;  %v2717_v47 = vld [vmem:[%s3196_s4 + $0x154] ss:$8 sps:$4 sm:$0xff]   ;;  %v2730_v49 = vld [vmem:[%s3196_s4 + $0x164] ss:$8 sps:$4 sm:$0xff]  }
  0x25   : > { %2018 = vmatmul.mubr.msk.bf16.gmra.mrb[8].mxu1 %vm465_vm0, %v2452_v21  ;;  %1441 = vmatprep.subr.bf16.mxu0 %v2251_v48  ;;  %v2723_v48 = vld [vmem:[%s3196_s4 + $0x150] ss:$8 sps:$4 sm:$0xff]   ;;  %v2735_v50 = vld [vmem:[%s3196_s4 + $0x160] ss:$8 sps:$4 sm:$0xff]   ;;  %v2757_v53 = vld [vmem:[%s3196_s4 + $0x184] ss:$8 sps:$4 sm:$0xff]  }
  0x26   : > { %558 = vmatprep.mubr.bf16.mxu1 %v2341_v3  ;;  %v2750_v52 = vld [vmem:[%s3196_s4 + $0x170] ss:$8 sps:$4 sm:$0xff]   ;;  %v2810_v60 = vld [vmem:[%s3196_s4 + $0x1c4] ss:$8 sps:$4 sm:$0xff]   ;;  %v2822_v62 = vld [vmem:[%s3196_s4 + $0x1d4] ss:$8 sps:$4 sm:$0xff]  }
  0x27   : > { %2041 = vmatmul.mubr.msk.bf16.gmra.mrb[8].mxu0 %vm944_vm2, %v411_v35  ;;  %v408_v35 = vld [vmem:[%s2447_s29 + $0x90] sm:$0xff] }
  0x28   : > { %1044 = vmatprep.mubr.bf16.mxu0 %v2341_v3  ;;  %1442 = vmatpush1.bf16.msra.mxu0 %v2249_v51  ;;  %v418_v37 = vpack.c.bf16 %v408_v35, %v408_v35  ;;  %v2744_v51 = vld [vmem:[%s3196_s4 + $0x174] ss:$8 sps:$4 sm:$0xff]   ;;  %v2803_v59 = vld [vmem:[%s3196_s4 + $0x1b0] ss:$8 sps:$4 sm:$0xff]  }
  0x29   : > { %1443 = vmatprep.subr.bf16.mxu0 %v2254_v54  ;;  %v2762_v54 = vld [vmem:[%s3196_s4 + $0x180] ss:$8 sps:$4 sm:$0xff]   ;;  %v2827_v63 = vld [vmem:[%s3196_s4 + $0x1d0] ss:$8 sps:$4 sm:$0xff]  }
  0x2c   : > { %1444 = vmatpush1.bf16.msra.mxu0 %v2252_v57  ;;  %v2784_v57 = vld [vmem:[%s3196_s4 + $0x1a4] ss:$8 sps:$4 sm:$0xff]  }
  0x2d   : > { %2019 = vmatmul.mubr.msk.bf16.gmra.mrb[12].mxu1 %vm465_vm0, %v2463_v27  ;;  %1445 = vmatprep.subr.bf16.mxu0 %v2257_v58  ;;  %v2789_v58 = vld [vmem:[%s3196_s4 + $0x1a0] ss:$8 sps:$4 sm:$0xff]  }
  0x2e   : > { %568 = vmatprep.mubr.bf16.mxu1 %v2341_v3 }
  0x2f   : > { %2042 = vmatmul.mubr.msk.bf16.gmra.mrb[12].mxu0 %vm944_vm2, %v412_v45  ;;  %v2703_v45 = vld [vmem:[%s3196_s4 + $0x144] ss:$8 sps:$4 sm:$0xff]  }
  0x30   : > { %1054 = vmatprep.mubr.bf16.mxu0 %v2341_v3  ;;  %1446 = vmatpush1.bf16.msra.mxu0 %v2255_v61  ;;  %v2815_v61 = vld [vmem:[%s3196_s4 + $0x1c0] ss:$8 sps:$4 sm:$0xff]  }
  0x31   : > { %1447 = vmatprep.subr.bf16.mxu0 %v2260_v0  ;;  %v2834_v0 = vld [vmem:[%s3196_s4 + $0x1e4] ss:$8 sps:$4 sm:$0xff]  }
  0x34   : > { %1448 = vmatpush1.bf16.msra.mxu0 %v2258_v4  ;;  %v2851_v4 = vld [vmem:[%s3196_s4 + $0x1f0] ss:$8 sps:$4 sm:$0xff]  }
  0x35   : > { %2020 = vmatmul.mubr.msk.bf16.gmra.mrb[16].mxu1 %vm465_vm0, %v2483_v36  ;;  %1449 = vmatprep.subr.bf16.mxu0 %v2263_v5  ;;  %v425_v5 = vlaneseq }
  0x36   : > { %578 = vmatprep.mubr.bf16.mxu1 %v2341_v3 }
  0x37   : > { %2043 = vmatmul.mubr.msk.bf16.gmra.mrb[16].mxu0 %vm944_vm2, %v413_v55  ;;  %v2771_v55 = vld [vmem:[%s3196_s4 + $0x194] ss:$8 sps:$4 sm:$0xff]   ;;  %v2855_v6 = vshrl.u32 %v425_v5, 7 }
  0x38   : > { %1064 = vmatprep.mubr.bf16.mxu0 %v2341_v3  ;;  %1450 = vmatpush1.bf16.msra.mxu0 %v2261_v9  ;;  %v2863_v9 = vld [vmem:[%s3195_s3] sm:$0xf] }
  0x39   : > { %1451 = vmatprep.subr.bf16.mxu0 %v2266_v13  ;;  %v2858_v7 = vsub.s32 0, %v2855_v6  ;;  %v2866_v10 = vsub.s32 1, %v2855_v6 }
  0x3b   : > { %v2870_v12 = vrot.slane %v2863_v9, %v2858_v7  ;;  %v2874_v13 = vrot.slane %v2863_v9, %v2866_v10 }
  0x3c   : > { %1452 = vmatpush1.bf16.msra.mxu0 %v2264_v16 }
  0x3d   : > { %2021 = vmatmul.mubr.msk.bf16.gmra.mrb[20].mxu1 %vm465_vm0, %v2506_v46  ;;  %1453 = vmatprep.subr.bf16.mxu0 %v2269_v17 }
  0x3e   : > { %588 = vmatprep.mubr.bf16.mxu1 %v2341_v3 }
  0x3f   : > { %2044 = vmatmul.mubr.msk.bf16.gmra.mrb[20].mxu0 %vm944_vm2, %v414_v1  ;;  %v2839_v1 = vld [vmem:[%s3196_s4 + $0x1e0] ss:$8 sps:$4 sm:$0xff]  }
  0x40   : > { %1074 = vmatprep.mubr.bf16.mxu0 %v2341_v3  ;;  %1454 = vmatpush1.bf16.msra.mxu0 %v2267_v20 }
  0x41   : > { %1455 = vmatprep.subr.bf16.mxu0 %v2272_v23 }
  0x44   : > { %1456 = vmatpush1.bf16.msra.mxu0 %v2270_v26 }
  0x45   : > { %2022 = vmatmul.mubr.msk.bf16.gmra.mrb[24].mxu1 %vm465_vm0, %v2529_v56  ;;  %1457 = vmatprep.subr.bf16.mxu0 %v2275_v28 }
  0x46   : > { %598 = vmatprep.mubr.bf16.mxu1 %v2341_v3 }
  0x47   : > { %2045 = vmatmul.mubr.msk.bf16.gmra.mrb[24].mxu0 %vm944_vm2, %v415_v14 }
  0x48   : > { %1084 = vmatprep.mubr.bf16.mxu0 %v2341_v3  ;;  %1458 = vmatpush1.bf16.msra.mxu0 %v2273_v31 }
  0x49   : > { %1459 = vmatprep.subr.bf16.mxu0 %v2278_v32 }
  0x4c   : > { %1460 = vmatpush1.bf16.msra.mxu0 %v2276_v34 }
  0x4d   : > { %2023 = vmatmul.mubr.msk.bf16.gmra.mrb[28].mxu1 %vm465_vm0, %v2552_v2  ;;  %1461 = vmatprep.subr.bf16.mxu0 %v2281_v38 }
  0x4e   : > { %608 = vmatprep.mubr.bf16.mxu1 %v2341_v3 }
  0x4f   : > { %2046 = vmatmul.mubr.msk.bf16.gmra.mrb[28].mxu0 %vm944_vm2, %v416_v24 }
  0x50   : > { %1094 = vmatprep.mubr.bf16.mxu0 %v2341_v3  ;;  %1462 = vmatpush1.bf16.msra.mxu0 %v2279_v39 }
  0x55   : > { %2024 = vmatmul.mubr.msk.bf16.gmra.mrb[32].mxu1 %vm465_vm0, %v2575_v15 }
  0x56   : > { %618 = vmatprep.mubr.bf16.mxu1 %v2341_v3 }
  0x57   : > { %2047 = vmatmul.mubr.msk.bf16.gmra.mrb[32].mxu0 %vm944_vm2, %v417_v33 }
  0x58   : > { %1104 = vmatprep.mubr.bf16.mxu0 %v2341_v3 }
  0x5d   : > { %2025 = vmatmul.mubr.msk.bf16.gmra.mrb[36].mxu1 %vm465_vm0, %v2597_v25 }
  0x5e   : > { %659 = vmatprep.mubr.bf16.mxu1 %v2341_v3 }
  0x5f   : > { %2048 = vmatmul.mubr.msk.bf16.gmra.mrb[36].mxu0 %vm944_vm2, %v418_v37 }
  0x65   : > { %2026 = vmatmul.mubr.msk.bf16.vlgmr.msra.gmra.mrb[40].mxu1 %vm465_vm0, %v2427_v8  ;;  %v2284_v8 = vld [vmem:[%s3196_s4 + $0xf4] ss:$8 sps:$4 sm:$0xff]  }
  0x66   : > { %669 = vmatprep.mubr.bf16.mxu1 %v2341_v3  ;;  %1463 = vmatprep.subr.bf16.mxu0 %v2284_v8 }
  0x67   : > { %1464 = vmatpush1.bf16.msra.mxu0 %v2282_v40 }
  0x6d   : > { %2027 = vmatmul.mubr.msk.bf16.gmra.mrb[44].mxu1 %vm465_vm0, %v2434_v11  ;;  %v2287_v11 = vld [vmem:[%s3196_s4 + $0x104] ss:$8 sps:$4 sm:$0xff]  }
  0x6e   : > { %679 = vmatprep.mubr.bf16.mxu1 %v2341_v3  ;;  %1564 = vmatprep.subr.bf16.mxu0 %v2287_v11 }
  0x6f   : > { %2116 = vmatprep.subr.bf16.mxu1 %v2287_v11 }
  0x70   : > { %2132 = vmatpush1.bf16.msra.mxu1 %v2655_v41 }
  0x75   : > { %2028 = vmatmul.mubr.msk.bf16.gmra.mrb[48].mxu1 %vm465_vm0, %v2452_v21  ;;  %v2663_v21 = vld [vmem:[%s3196_s4 + $0x114] ss:$8 sps:$4 sm:$0xff]  }
  0x76   : > { %689 = vmatprep.mubr.bf16.mxu1 %v2341_v3  ;;  %2117 = vmatprep.subr.bf16.mxu1 %v2663_v21 }
  0x7d   : > { %2029 = vmatmul.mubr.msk.bf16.gmra.mrb[52].mxu1 %vm465_vm0, %v2463_v27  ;;  %v2669_v27 = vld [vmem:[%s3196_s4 + $0x110] ss:$8 sps:$4 sm:$0xff]  }
  0x7e   : > { %699 = vmatprep.mubr.bf16.mxu1 %v2341_v3  ;;  %2133 = vmatpush1.bf16.msra.mxu1 %v2669_v27 }
  0x85   : > { %2030 = vmatmul.mubr.msk.bf16.gmra.mrb[56].mxu1 %vm465_vm0, %v2483_v36  ;;  %v2676_v36 = vld [vmem:[%s3196_s4 + $0x124] ss:$8 sps:$4 sm:$0xff]  }
  0x86   : > { %709 = vmatprep.mubr.bf16.mxu1 %v2341_v3  ;;  %2118 = vmatprep.subr.bf16.mxu1 %v2676_v36 }
  0x87   : > { %2134 = vmatpush1.bf16.msra.mxu1 %v2681_v42 }
  0x88   : > { %2119 = vmatprep.subr.bf16.mxu1 %v2690_v43 }
  0x8b   : > { %2135 = vmatpush1.bf16.msra.mxu1 %v2696_v44 }
  0x8c   : > { %2120 = vmatprep.subr.bf16.mxu1 %v2703_v45 }
  0x8d   : > { %2031 = vmatmul.mubr.msk.bf16.gmra.mrb[60].mxu1 %vm465_vm0, %v2506_v46  ;;  %v2708_v46 = vld [vmem:[%s3196_s4 + $0x140] ss:$8 sps:$4 sm:$0xff]  }
  0x8e   : > { %719 = vmatprep.mubr.bf16.mxu1 %v2341_v3 }
  0x8f   : > { %2136 = vmatpush1.bf16.msra.mxu1 %v2708_v46 }
  0x90   : > { %2121 = vmatprep.subr.bf16.mxu1 %v2717_v47 }
  0x93   : > { %2137 = vmatpush1.bf16.msra.mxu1 %v2723_v48 }
  0x94   : > { %2122 = vmatprep.subr.bf16.mxu1 %v2730_v49 }
  0x95   : > { %2032 = vmatmul.mubr.msk.bf16.gmra.mrb[64].mxu1 %vm465_vm0, %v2529_v56  ;;  %v2777_v56 = vld [vmem:[%s3196_s4 + $0x190] ss:$8 sps:$4 sm:$0xff]  }
  0x96   : > { %729 = vmatprep.mubr.bf16.mxu1 %v2341_v3 }
  0x97   : > { %2138 = vmatpush1.bf16.msra.mxu1 %v2735_v50 }
  0x98   : > { %2123 = vmatprep.subr.bf16.mxu1 %v2744_v51 }
  0x9b   : > { %2139 = vmatpush1.bf16.msra.mxu1 %v2750_v52 }
  0x9c   : > { %2124 = vmatprep.subr.bf16.mxu1 %v2757_v53 }
  0x9d   : > { %2033 = vmatmul.mubr.msk.bf16.gmra.mrb[68].mxu1 %vm465_vm0, %v2552_v2  ;;  %v2846_v2 = vld [vmem:[%s3196_s4 + $0x1f4] ss:$8 sps:$4 sm:$0xff]  }
  0x9e   : > { %739 = vmatprep.mubr.bf16.mxu1 %v2341_v3 }
  0x9f   : > { %2140 = vmatpush1.bf16.msra.mxu1 %v2762_v54 }
  0xa0   : > { %2125 = vmatprep.subr.bf16.mxu1 %v2771_v55 }
  0xa3   : > { %2141 = vmatpush1.bf16.msra.mxu1 %v2777_v56 }
  0xa4   : > { %2126 = vmatprep.subr.bf16.mxu1 %v2784_v57 }
  0xa5   : > { %2034 = vmatmul.mubr.msk.bf16.gmra.mrb[72].mxu1 %vm465_vm0, %v2575_v15 }
  0xa6   : > { %749 = vmatprep.mubr.bf16.mxu1 %v2341_v3  ;;  %v2798_v3 = vld [vmem:[%s3196_s4 + $0x1b4] ss:$8 sps:$4 sm:$0xff]  }
  0xa7   : > { %2142 = vmatpush1.bf16.msra.mxu1 %v2789_v58 }
  0xa8   : > { %2127 = vmatprep.subr.bf16.mxu1 %v2798_v3 }
  0xab   : > { %2143 = vmatpush1.bf16.msra.mxu1 %v2803_v59 }
  0xac   : > { %2128 = vmatprep.subr.bf16.mxu1 %v2810_v60 }
  0xad   : > { %2035 = vmatmul.mubr.msk.bf16.gmra.mrb[76].mxu1 %vm465_vm0, %v2597_v25 }
  0xaf   : > { %2144 = vmatpush1.bf16.msra.mxu1 %v2815_v61 }
  0xb0   : > { %2129 = vmatprep.subr.bf16.mxu1 %v2822_v62 }
  0xb3   : > { %2145 = vmatpush1.bf16.msra.mxu1 %v2827_v63 }
  0xb4   : > { %2130 = vmatprep.subr.bf16.mxu1 %v2834_v0 }
  0xb7   : > { %2146 = vmatpush1.bf16.msra.mxu1 %v2839_v1 }
  0xb8   : > { %2131 = vmatprep.subr.bf16.mxu1 %v2846_v2 }
  0xbb   : > { %2147 = vmatpush1.bf16.msra.mxu1 %v2851_v4 }
  0xe8   : > { %v530_v14 = vpop.f32.mrb[0].mxu1 }
  0xe9   : > { %v531_v15 = vadd.f32 %v530_v14, %v2870_v12  ;;  %v532_v16 = vpop.f32.mrb[1].mxu1 }
  0xea   : > { %v533_v17 = vadd.f32 %v532_v16, %v2874_v13  ;;  %v534_v18 = vpop.f32.mrb[2].mxu1 }
  0xeb   : > { %v535_v19 = vadd.f32 %v534_v18, %v2870_v12  ;;  %v536_v20 = vpop.f32.mrb[3].mxu1  ;;  %v758_v23 = vmax.f32 %v531_v15, 0.0 }
  0xec   : > { %v537_v22 = vadd.f32 %v536_v20, %v2874_v13  ;;  %v759_v25 = vmax.f32 %v533_v17, 0.0 }
  0xed   : > { %v762_v24 = vmax.f32 %v535_v19, 0.0 }
  0xee   : > { %v763_v26 = vmax.f32 %v537_v22, 0.0 }
  0xef   : > { %v834_v28 = vpack.c.bf16 %v762_v24, %v758_v23 }
  0xf0   : > { %v835_v29 = vpack.c.bf16 %v763_v26, %v759_v25  ;;  %v540_v30 = vpop.f32.mrb[4].mxu1 }
  0xf1   : > { %v541_v31 = vadd.f32 %v540_v30, %v2870_v12  ;;  %v542_v32 = vpop.f32.mrb[5].mxu1 }
  0xf2   : > { %v543_v33 = vadd.f32 %v542_v32, %v2874_v13  ;;  %v544_v34 = vpop.f32.mrb[6].mxu1  ;;  %1465 = vmatprep.mubr.bf16.mxu0 %v835_v29 }
  0xf3   : > { %v545_v35 = vadd.f32 %v544_v34, %v2870_v12  ;;  %v546_v37 = vpop.f32.mrb[7].mxu1  ;;  %1466 = vmatmul.mubr.bf16.vlgmr.msra.gmra.mrb[0].mxu0 %v834_v28  ;;  %v766_v39 = vmax.f32 %v541_v31, 0.0 }
  0xf4   : > { %v547_v38 = vadd.f32 %v546_v37, %v2874_v13  ;;  %1565 = vmatpush1.bf16.msra.mxu0 %v2655_v41  ;;  %v767_v40 = vmax.f32 %v543_v33, 0.0 }
  0xf5   : > { %v770_v8 = vmax.f32 %v545_v35, 0.0  ;;  %1566 = vmatprep.subr.bf16.mxu0 %v2663_v21 }
  0xf6   : > { %v771_v11 = vmax.f32 %v547_v38, 0.0 }
  0xf7   : > { %v838_v5 = vpack.c.bf16 %v770_v8, %v766_v39 }
  0xf8   : > { %v839_v14 = vpack.c.bf16 %v771_v11, %v767_v40  ;;  %v550_v15 = vpop.f32.mrb[8].mxu1  ;;  %1567 = vmatpush1.bf16.msra.mxu0 %v2669_v27 }
  0xf9   : > { %v551_v16 = vadd.f32 %v550_v15, %v2870_v12  ;;  %v552_v17 = vpop.f32.mrb[9].mxu1  ;;  %1568 = vmatprep.subr.bf16.mxu0 %v2676_v36 }
  0xfa   : > { %v553_v18 = vadd.f32 %v552_v17, %v2874_v13  ;;  %v554_v19 = vpop.f32.mrb[10].mxu1  ;;  %1475 = vmatprep.mubr.bf16.mxu0 %v839_v14 }
  0xfb   : > { %v555_v41 = vadd.f32 %v554_v19, %v2870_v12  ;;  %v556_v20 = vpop.f32.mrb[11].mxu1  ;;  %1476 = vmatmul.mubr.bf16.gmra.mrb[4].mxu0 %v838_v5  ;;  %v774_v22 = vmax.f32 %v551_v16, 0.0 }
  0xfc   : > { %v557_v21 = vadd.f32 %v556_v20, %v2874_v13  ;;  %1569 = vmatpush1.bf16.msra.mxu0 %v2681_v42  ;;  %v775_v27 = vmax.f32 %v553_v18, 0.0 }
  0xfd   : > { %v778_v23 = vmax.f32 %v555_v41, 0.0  ;;  %1570 = vmatprep.subr.bf16.mxu0 %v2690_v43 }
  0xfe   : > { %v779_v24 = vmax.f32 %v557_v21, 0.0 }
  0xff   : > { %v842_v25 = vpack.c.bf16 %v778_v23, %v774_v22 }
 0x100   : > { %v843_v36 = vpack.c.bf16 %v779_v24, %v775_v27  ;;  %v560_v26 = vpop.f32.mrb[12].mxu1  ;;  %1571 = vmatpush1.bf16.msra.mxu0 %v2696_v44 }
 0x101   : > { %v561_v28 = vadd.f32 %v560_v26, %v2870_v12  ;;  %v562_v29 = vpop.f32.mrb[13].mxu1  ;;  %1572 = vmatprep.subr.bf16.mxu0 %v2703_v45 }
 0x102   : > { %v563_v30 = vadd.f32 %v562_v29, %v2874_v13  ;;  %v564_v31 = vpop.f32.mrb[14].mxu1  ;;  %1485 = vmatprep.mubr.bf16.mxu0 %v843_v36 }
 0x103   : > { %v565_v42 = vadd.f32 %v564_v31, %v2870_v12  ;;  %v566_v32 = vpop.f32.mrb[15].mxu1  ;;  %1486 = vmatmul.mubr.bf16.gmra.mrb[8].mxu0 %v842_v25  ;;  %v782_v33 = vmax.f32 %v561_v28, 0.0 }
 0x104   : > { %v567_v43 = vadd.f32 %v566_v32, %v2874_v13  ;;  %1573 = vmatpush1.bf16.msra.mxu0 %v2708_v46  ;;  %v783_v44 = vmax.f32 %v563_v30, 0.0 }
 0x105   : > { %v786_v34 = vmax.f32 %v565_v42, 0.0  ;;  %1574 = vmatprep.subr.bf16.mxu0 %v2717_v47 }
 0x106   : > { %v787_v35 = vmax.f32 %v567_v43, 0.0 }
 0x107   : > { %v846_v37 = vpack.c.bf16 %v786_v34, %v782_v33 }
 0x108   : > { %v847_v45 = vpack.c.bf16 %v787_v35, %v783_v44  ;;  %v570_v38 = vpop.f32.mrb[16].mxu1  ;;  %1575 = vmatpush1.bf16.msra.mxu0 %v2723_v48 }
 0x109   : > { %v571_v39 = vadd.f32 %v570_v38, %v2870_v12  ;;  %v572_v8 = vpop.f32.mrb[17].mxu1  ;;  %1576 = vmatprep.subr.bf16.mxu0 %v2730_v49 }
 0x10a   : > { %v573_v40 = vadd.f32 %v572_v8, %v2874_v13  ;;  %v574_v11 = vpop.f32.mrb[18].mxu1  ;;  %1495 = vmatprep.mubr.bf16.mxu0 %v847_v45 }
 0x10b   : > { %v575_v46 = vadd.f32 %v574_v11, %v2870_v12  ;;  %v576_v5 = vpop.f32.mrb[19].mxu1  ;;  %1496 = vmatmul.mubr.bf16.gmra.mrb[12].mxu0 %v846_v37  ;;  %v790_v14 = vmax.f32 %v571_v39, 0.0 }
 0x10c   : > { %v577_v47 = vadd.f32 %v576_v5, %v2874_v13  ;;  %1577 = vmatpush1.bf16.msra.mxu0 %v2735_v50  ;;  %v791_v48 = vmax.f32 %v573_v40, 0.0 }
 0x10d   : > { %v794_v15 = vmax.f32 %v575_v46, 0.0  ;;  %1578 = vmatprep.subr.bf16.mxu0 %v2744_v51 }
 0x10e   : > { %v795_v16 = vmax.f32 %v577_v47, 0.0 }
 0x10f   : > { %v850_v17 = vpack.c.bf16 %v794_v15, %v790_v14 }
 0x110   : > { %v851_v49 = vpack.c.bf16 %v795_v16, %v791_v48  ;;  %v580_v18 = vpop.f32.mrb[20].mxu1  ;;  %1579 = vmatpush1.bf16.msra.mxu0 %v2750_v52 }
 0x111   : > { %v581_v19 = vadd.f32 %v580_v18, %v2870_v12  ;;  %v582_v41 = vpop.f32.mrb[21].mxu1  ;;  %1580 = vmatprep.subr.bf16.mxu0 %v2757_v53 }
 0x112   : > { %v583_v20 = vadd.f32 %v582_v41, %v2874_v13  ;;  %v584_v21 = vpop.f32.mrb[22].mxu1  ;;  %1505 = vmatprep.mubr.bf16.mxu0 %v851_v49 }
 0x113   : > { %v585_v50 = vadd.f32 %v584_v21, %v2870_v12  ;;  %v586_v22 = vpop.f32.mrb[23].mxu1  ;;  %1506 = vmatmul.mubr.bf16.gmra.mrb[16].mxu0 %v850_v17  ;;  %v798_v23 = vmax.f32 %v581_v19, 0.0  ;;  %v435_v21 = vsub.s32 2, %v2855_v6 }
 0x114   : > { %v587_v51 = vadd.f32 %v586_v22, %v2874_v13  ;;  %1581 = vmatpush1.bf16.msra.mxu0 %v2762_v54  ;;  %v799_v52 = vmax.f32 %v583_v20, 0.0 }
 0x115   : > { %v802_v27 = vmax.f32 %v585_v50, 0.0  ;;  %1582 = vmatprep.subr.bf16.mxu0 %v2771_v55 }
 0x116   : > { %v803_v24 = vmax.f32 %v587_v51, 0.0 }
 0x117   : > { %v854_v25 = vpack.c.bf16 %v802_v27, %v798_v23  ;;  %v2948_v27 = vrot.slane %v2863_v9, %v435_v21 }
 0x118   : > { %v855_v53 = vpack.c.bf16 %v803_v24, %v799_v52  ;;  %v590_v36 = vpop.f32.mrb[24].mxu1  ;;  %1583 = vmatpush1.bf16.msra.mxu0 %v2777_v56 }
 0x119   : > { %v591_v26 = vadd.f32 %v590_v36, %v2870_v12  ;;  %v592_v28 = vpop.f32.mrb[25].mxu1  ;;  %1584 = vmatprep.subr.bf16.mxu0 %v2784_v57 }
 0x11a   : > { %v593_v29 = vadd.f32 %v592_v28, %v2874_v13  ;;  %v594_v30 = vpop.f32.mrb[26].mxu1  ;;  %1515 = vmatprep.mubr.bf16.mxu0 %v855_v53 }
 0x11b   : > { %v595_v54 = vadd.f32 %v594_v30, %v2870_v12  ;;  %v596_v31 = vpop.f32.mrb[27].mxu1  ;;  %1516 = vmatmul.mubr.bf16.gmra.mrb[20].mxu0 %v854_v25  ;;  %v806_v42 = vmax.f32 %v591_v26, 0.0 }
 0x11c   : > { %v597_v55 = vadd.f32 %v596_v31, %v2874_v13  ;;  %1585 = vmatpush1.bf16.msra.mxu0 %v2789_v58  ;;  %v807_v56 = vmax.f32 %v593_v29, 0.0 }
 0x11d   : > { %v810_v32 = vmax.f32 %v595_v54, 0.0  ;;  %1586 = vmatprep.subr.bf16.mxu0 %v2798_v3 }
 0x11e   : > { %v811_v43 = vmax.f32 %v597_v55, 0.0 }
 0x11f   : > { %v858_v33 = vpack.c.bf16 %v810_v32, %v806_v42 }
 0x120   : > { %v859_v57 = vpack.c.bf16 %v811_v43, %v807_v56  ;;  %v600_v34 = vpop.f32.mrb[28].mxu1  ;;  %1587 = vmatpush1.bf16.msra.mxu0 %v2803_v59 }
 0x121   : > { %v601_v44 = vadd.f32 %v600_v34, %v2870_v12  ;;  %v602_v35 = vpop.f32.mrb[29].mxu1  ;;  %1588 = vmatprep.subr.bf16.mxu0 %v2810_v60 }
 0x122   : > { %v603_v37 = vadd.f32 %v602_v35, %v2874_v13  ;;  %v604_v45 = vpop.f32.mrb[30].mxu1  ;;  %1525 = vmatprep.mubr.bf16.mxu0 %v859_v57 }
 0x123   : > { %v605_v58 = vadd.f32 %v604_v45, %v2870_v12  ;;  %v606_v38 = vpop.f32.mrb[31].mxu1  ;;  %1526 = vmatmul.mubr.bf16.gmra.mrb[24].mxu0 %v858_v33  ;;  %v814_v39 = vmax.f32 %v601_v44, 0.0 }
 0x124   : > { %v607_v3 = vadd.f32 %v606_v38, %v2874_v13  ;;  %1589 = vmatpush1.bf16.msra.mxu0 %v2815_v61  ;;  %v815_v59 = vmax.f32 %v603_v37, 0.0 }
 0x125   : > { %v818_v8 = vmax.f32 %v605_v58, 0.0  ;;  %1590 = vmatprep.subr.bf16.mxu0 %v2822_v62 }
 0x126   : > { %v819_v40 = vmax.f32 %v607_v3, 0.0 }
 0x127   : > { %v862_v11 = vpack.c.bf16 %v818_v8, %v814_v39 }
 0x128   : > { %v863_v60 = vpack.c.bf16 %v819_v40, %v815_v59  ;;  %v610_v46 = vpop.f32.mrb[32].mxu1  ;;  %1591 = vmatpush1.bf16.msra.mxu0 %v2827_v63 }
 0x129   : > { %v611_v5 = vadd.f32 %v610_v46, %v2870_v12  ;;  %v612_v47 = vpop.f32.mrb[33].mxu1  ;;  %1592 = vmatprep.subr.bf16.mxu0 %v2834_v0 }
 0x12a   : > { %v613_v14 = vadd.f32 %v612_v47, %v2874_v13  ;;  %v614_v15 = vpop.f32.mrb[34].mxu1  ;;  %1535 = vmatprep.mubr.bf16.mxu0 %v863_v60 }
 0x12b   : > { %v615_v61 = vadd.f32 %v614_v15, %v2870_v12  ;;  %v616_v48 = vpop.f32.mrb[35].mxu1  ;;  %1536 = vmatmul.mubr.bf16.gmra.mrb[28].mxu0 %v862_v11  ;;  %v822_v16 = vmax.f32 %v611_v5, 0.0 }
 0x12c   : > { %v617_v62 = vadd.f32 %v616_v48, %v2874_v13  ;;  %1593 = vmatpush1.bf16.msra.mxu0 %v2839_v1  ;;  %v823_v63 = vmax.f32 %v613_v14, 0.0  ;;  %v439_v1 = vsub.s32 3, %v2855_v6 }
 0x12d   : > { %v826_v17 = vmax.f32 %v615_v61, 0.0  ;;  %1594 = vmatprep.subr.bf16.mxu0 %v2846_v2 }
 0x12e   : > { %v827_v49 = vmax.f32 %v617_v62, 0.0 }
 0x12f   : > { %v866_v18 = vpack.c.bf16 %v826_v17, %v822_v16 }
 0x130   : > { %v867_v0 = vpack.c.bf16 %v827_v49, %v823_v63  ;;  %v620_v19 = vpop.f32.mrb[36].mxu1  ;;  %1595 = vmatpush1.bf16.msra.mxu0 %v2851_v4  ;;  %v2951_v4 = vrot.slane %v2863_v9, %v439_v1 }
 0x131   : > { %v621_v41 = vadd.f32 %v620_v19, %v2870_v12  ;;  %v622_v20 = vpop.f32.mrb[37].mxu1 }
 0x132   : > { %v623_v50 = vadd.f32 %v622_v20, %v2874_v13  ;;  %v624_v22 = vpop.f32.mrb[38].mxu1  ;;  %1545 = vmatprep.mubr.bf16.mxu0 %v867_v0  ;;  %v2957_v31 = vpop.f32.mrb[36].mxu0 }
 0x133   : > { %v625_v51 = vpop.f32.mrb[39].mxu1  ;;  %1546 = vmatmul.mubr.bf16.gmra.mrb[32].mxu0 %v866_v18  ;;  %v830_v23 = vmax.f32 %v621_v41, 0.0  ;;  %v2959_v42 = vpop.f32.mrb[37].mxu0 }
 0x134   : > { %v831_v2 = vmax.f32 %v623_v50, 0.0  ;;  %v1110_v43 = vpop.f32.mrb[38].mxu0 }
 0x135   : > { %v870_v24 = vpack.c.bf16 %v830_v23, %v830_v23  ;;  %v1111_v34 = vpop.f32.mrb[39].mxu0 }
 0x136   : > { %v871_v52 = vpack.c.bf16 %v831_v2, %v831_v2 }
 0x138   : > { %v661_v12 = vpop.f32.mrb[40].mxu1  ;;  %1555 = vmatprep.mubr.bf16.mxu0 %v871_v52 }
 0x139   : > { %v662_v13 = vadd.f32 %v661_v12, %v2948_v27  ;;  %v663_v25 = vpop.f32.mrb[41].mxu1 }
 0x13a   : > { %v664_v53 = vadd.f32 %v663_v25, %v2951_v4  ;;  %v665_v6 = vpop.f32.mrb[42].mxu1 }
 0x13b   : > { %v666_v36 = vadd.f32 %v665_v6, %v2948_v27  ;;  %v667_v26 = vpop.f32.mrb[43].mxu1  ;;  %1556 = vmatmul.mubr.bf16.gmra.mrb[40].mxu0 %v870_v24  ;;  %v760_v29 = vmax.f32 %v662_v13, 0.0 }
 0x13c   : > { %v668_v28 = vadd.f32 %v667_v26, %v2951_v4  ;;  %v761_v54 = vmax.f32 %v664_v53, 0.0 }
 0x13d   : > { %v764_v30 = vmax.f32 %v666_v36, 0.0 }
 0x13e   : > { %v765_v9 = vmax.f32 %v668_v28, 0.0 }
 0x13f   : > { %v836_v55 = vpack.c.bf16 %v764_v30, %v760_v29 }
 0x140   : > { %v837_v32 = vpack.c.bf16 %v765_v9, %v761_v54  ;;  %v671_v56 = vpop.f32.mrb[44].mxu1 }
 0x141   : > { %v672_v33 = vadd.f32 %v671_v56, %v2948_v27  ;;  %v673_v57 = vpop.f32.mrb[45].mxu1 }
 0x142   : > { %v674_v44 = vadd.f32 %v673_v57, %v2951_v4  ;;  %v675_v35 = vpop.f32.mrb[46].mxu1  ;;  %1596 = vmatprep.mubr.bf16.mxu0 %v837_v32 }
 0x143   : > { %v676_v37 = vadd.f32 %v675_v35, %v2948_v27  ;;  %v677_v45 = vpop.f32.mrb[47].mxu1  ;;  %1597 = vmatmul.mubr.bf16.vlgmr.msra.gmra.mrb[0].mxu0 %v836_v55  ;;  %v768_v38 = vmax.f32 %v672_v33, 0.0 }
 0x144   : > { %v678_v58 = vadd.f32 %v677_v45, %v2951_v4  ;;  %v769_v39 = vmax.f32 %v674_v44, 0.0 }
 0x145   : > { %v772_v3 = vmax.f32 %v676_v37, 0.0 }
 0x146   : > { %v773_v8 = vmax.f32 %v678_v58, 0.0 }
 0x147   : > { %v840_v59 = vpack.c.bf16 %v772_v3, %v768_v38 }
 0x148   : > { %v841_v40 = vpack.c.bf16 %v773_v8, %v769_v39  ;;  %v681_v11 = vpop.f32.mrb[48].mxu1 }
 0x149   : > { %v682_v60 = vadd.f32 %v681_v11, %v2948_v27  ;;  %v683_v46 = vpop.f32.mrb[49].mxu1 }
 0x14a   : > { %v684_v5 = vadd.f32 %v683_v46, %v2951_v4  ;;  %v685_v47 = vpop.f32.mrb[50].mxu1  ;;  %1606 = vmatprep.mubr.bf16.mxu0 %v841_v40 }
 0x14b   : > { %v686_v14 = vadd.f32 %v685_v47, %v2948_v27  ;;  %v687_v15 = vpop.f32.mrb[51].mxu1  ;;  %1607 = vmatmul.mubr.bf16.gmra.mrb[4].mxu0 %v840_v59  ;;  %v776_v48 = vmax.f32 %v682_v60, 0.0 }
 0x14c   : > { %v688_v61 = vadd.f32 %v687_v15, %v2951_v4  ;;  %v777_v16 = vmax.f32 %v684_v5, 0.0 }
 0x14d   : > { %v780_v62 = vmax.f32 %v686_v14, 0.0 }
 0x14e   : > { %v781_v17 = vmax.f32 %v688_v61, 0.0 }
 0x14f   : > { %v844_v63 = vpack.c.bf16 %v780_v62, %v776_v48 }
 0x150   : > { %v845_v49 = vpack.c.bf16 %v781_v17, %v777_v16  ;;  %v691_v18 = vpop.f32.mrb[52].mxu1 }
 0x151   : > { %v692_v0 = vadd.f32 %v691_v18, %v2948_v27  ;;  %v693_v19 = vpop.f32.mrb[53].mxu1 }
 0x152   : > { %v694_v41 = vadd.f32 %v693_v19, %v2951_v4  ;;  %v695_v20 = vpop.f32.mrb[54].mxu1  ;;  %1616 = vmatprep.mubr.bf16.mxu0 %v845_v49 }
 0x153   : > { %v696_v21 = vadd.f32 %v695_v20, %v2948_v27  ;;  %v697_v50 = vpop.f32.mrb[55].mxu1  ;;  %1617 = vmatmul.mubr.bf16.gmra.mrb[8].mxu0 %v844_v63  ;;  %v784_v1 = vmax.f32 %v692_v0, 0.0 }
 0x154   : > { %v698_v22 = vadd.f32 %v697_v50, %v2951_v4  ;;  %v785_v2 = vmax.f32 %v694_v41, 0.0 }
 0x155   : > { %v788_v51 = vmax.f32 %v696_v21, 0.0 }
 0x156   : > { %v789_v23 = vmax.f32 %v698_v22, 0.0 }
 0x157   : > { %v848_v52 = vpack.c.bf16 %v788_v51, %v784_v1 }
 0x158   : > { %v849_v12 = vpack.c.bf16 %v789_v23, %v785_v2  ;;  %v701_v24 = vpop.f32.mrb[56].mxu1 }
 0x159   : > { %v702_v13 = vadd.f32 %v701_v24, %v2948_v27  ;;  %v703_v25 = vpop.f32.mrb[57].mxu1 }
 0x15a   : > { %v704_v53 = vadd.f32 %v703_v25, %v2951_v4  ;;  %v705_v6 = vpop.f32.mrb[58].mxu1  ;;  %1626 = vmatprep.mubr.bf16.mxu0 %v849_v12 }
 0x15b   : > { %v706_v36 = vadd.f32 %v705_v6, %v2948_v27  ;;  %v707_v26 = vpop.f32.mrb[59].mxu1  ;;  %1627 = vmatmul.mubr.bf16.gmra.mrb[12].mxu0 %v848_v52  ;;  %v792_v29 = vmax.f32 %v702_v13, 0.0 }
 0x15c   : > { %v708_v28 = vadd.f32 %v707_v26, %v2951_v4  ;;  %v793_v54 = vmax.f32 %v704_v53, 0.0 }
 0x15d   : > { %v796_v30 = vmax.f32 %v706_v36, 0.0 }
 0x15e   : > { %v797_v9 = vmax.f32 %v708_v28, 0.0 }
 0x15f   : > { %v852_v55 = vpack.c.bf16 %v796_v30, %v792_v29 }
 0x160   : > { %v853_v32 = vpack.c.bf16 %v797_v9, %v793_v54  ;;  %v711_v56 = vpop.f32.mrb[60].mxu1 }
 0x161   : > { %v712_v43 = vadd.f32 %v711_v56, %v2948_v27  ;;  %v713_v33 = vpop.f32.mrb[61].mxu1 }
 0x162   : > { %v714_v57 = vadd.f32 %v713_v33, %v2951_v4  ;;  %v715_v34 = vpop.f32.mrb[62].mxu1  ;;  %1636 = vmatprep.mubr.bf16.mxu0 %v853_v32 }
 0x163   : > { %v716_v44 = vadd.f32 %v715_v34, %v2948_v27  ;;  %v717_v35 = vpop.f32.mrb[63].mxu1  ;;  %1637 = vmatmul.mubr.bf16.gmra.mrb[16].mxu0 %v852_v55  ;;  %v800_v45 = vmax.f32 %v712_v43, 0.0 }
 0x164   : > { %v718_v37 = vadd.f32 %v717_v35, %v2951_v4  ;;  %v801_v38 = vmax.f32 %v714_v57, 0.0 }
 0x165   : > { %v804_v58 = vmax.f32 %v716_v44, 0.0 }
 0x166   : > { %v805_v3 = vmax.f32 %v718_v37, 0.0 }
 0x167   : > { %v856_v39 = vpack.c.bf16 %v804_v58, %v800_v45 }
 0x168   : > { %v857_v8 = vpack.c.bf16 %v805_v3, %v801_v38  ;;  %v721_v59 = vpop.f32.mrb[64].mxu1 }
 0x169   : > { %v722_v40 = vadd.f32 %v721_v59, %v2948_v27  ;;  %v723_v11 = vpop.f32.mrb[65].mxu1 }
 0x16a   : > { %v724_v60 = vadd.f32 %v723_v11, %v2951_v4  ;;  %v725_v46 = vpop.f32.mrb[66].mxu1  ;;  %1646 = vmatprep.mubr.bf16.mxu1 %v857_v8 }
 0x16b   : > { %v726_v5 = vadd.f32 %v725_v46, %v2948_v27  ;;  %v727_v47 = vpop.f32.mrb[67].mxu1  ;;  %1647 = vmatmul.mubr.bf16.vlgmr.msra.gmra.mrb[80].mxu1 %v856_v39  ;;  %v808_v15 = vmax.f32 %v722_v40, 0.0 }
 0x16c   : > { %v728_v14 = vadd.f32 %v727_v47, %v2951_v4  ;;  %v809_v48 = vmax.f32 %v724_v60, 0.0 }
 0x16d   : > { %v812_v61 = vmax.f32 %v726_v5, 0.0 }
 0x16e   : > { %v813_v62 = vmax.f32 %v728_v14, 0.0 }
 0x16f   : > { %v860_v16 = vpack.c.bf16 %v812_v61, %v808_v15 }
 0x170   : > { %v861_v17 = vpack.c.bf16 %v813_v62, %v809_v48  ;;  %v731_v63 = vpop.f32.mrb[68].mxu1 }
 0x171   : > { %v732_v49 = vadd.f32 %v731_v63, %v2948_v27  ;;  %v733_v18 = vpop.f32.mrb[69].mxu1 }
 0x172   : > { %v734_v0 = vadd.f32 %v733_v18, %v2951_v4  ;;  %v735_v19 = vpop.f32.mrb[70].mxu1  ;;  %1656 = vmatprep.mubr.bf16.mxu1 %v861_v17  ;;  %v1695_v17 = vld [vmem:[%s3198_s6] sm:$0x3] }
 0x173   : > { %v736_v41 = vadd.f32 %v735_v19, %v2948_v27  ;;  %v737_v20 = vpop.f32.mrb[71].mxu1  ;;  %1657 = vmatmul.mubr.bf16.gmra.mrb[84].mxu1 %v860_v16  ;;  %v816_v50 = vmax.f32 %v732_v49, 0.0  ;;  %v3037_v49 = vrot.slane %v1695_v17, %v2858_v7  ;;  %v3040_v18 = vrot.slane %v1695_v17, %v2866_v10 }
 0x174   : > { %v738_v21 = vadd.f32 %v737_v20, %v2951_v4  ;;  %v817_v1 = vmax.f32 %v734_v0, 0.0 }
 0x175   : > { %v820_v22 = vmax.f32 %v736_v41, 0.0 }
 0x176   : > { %v821_v51 = vmax.f32 %v738_v21, 0.0 }
 0x177   : > { %v864_v2 = vpack.c.bf16 %v820_v22, %v816_v50 }
 0x178   : > { %v865_v23 = vpack.c.bf16 %v821_v51, %v817_v1  ;;  %v741_v52 = vpop.f32.mrb[72].mxu1 }
 0x179   : > { %v742_v12 = vadd.f32 %v741_v52, %v2948_v27  ;;  %v743_v24 = vpop.f32.mrb[73].mxu1 }
 0x17a   : > { %v744_v13 = vadd.f32 %v743_v24, %v2951_v4  ;;  %v745_v25 = vpop.f32.mrb[74].mxu1  ;;  %1666 = vmatprep.mubr.bf16.mxu1 %v865_v23 }
 0x17b   : > { %v746_v53 = vadd.f32 %v745_v25, %v2948_v27  ;;  %v747_v6 = vpop.f32.mrb[75].mxu1  ;;  %1667 = vmatmul.mubr.bf16.gmra.mrb[88].mxu1 %v864_v2  ;;  %v824_v26 = vmax.f32 %v742_v12, 0.0 }
 0x17c   : > { %v748_v36 = vadd.f32 %v747_v6, %v2951_v4  ;;  %v825_v29 = vmax.f32 %v744_v13, 0.0 }
 0x17d   : > { %v828_v28 = vmax.f32 %v746_v53, 0.0 }
 0x17e   : > { %v829_v30 = vmax.f32 %v748_v36, 0.0 }
 0x17f   : > { %v868_v54 = vpack.c.bf16 %v828_v28, %v824_v26 }
 0x180   : > { %v869_v9 = vpack.c.bf16 %v829_v30, %v825_v29  ;;  %v751_v55 = vpop.f32.mrb[76].mxu1 }
 0x181   : > { %v752_v32 = vadd.f32 %v751_v55, %v2948_v27  ;;  %v753_v56 = vpop.f32.mrb[77].mxu1 }
 0x182   : > { %v754_v43 = vadd.f32 %v753_v56, %v2951_v4  ;;  %v755_v33 = vpop.f32.mrb[78].mxu1  ;;  %1676 = vmatprep.mubr.bf16.mxu1 %v869_v9 }
 0x183   : > { %v756_v57 = vpop.f32.mrb[79].mxu1  ;;  %1677 = vmatmul.mubr.bf16.gmra.mrb[92].mxu1 %v868_v54  ;;  %v832_v44 = vmax.f32 %v752_v32, 0.0 }
 0x184   : > { %v833_v34 = vmax.f32 %v754_v43, 0.0 }
 0x185   : > { %v872_v37 = vpack.c.bf16 %v832_v44, %v832_v44 }
 0x186   : > { %v873_v35 = vpack.c.bf16 %v833_v34, %v833_v34 }
 0x188   : > { %1686 = vmatprep.mubr.bf16.mxu1 %v873_v35 }
 0x18b   : > { %1687 = vmatmul.mubr.bf16.gmra.mrb[96].mxu1 %v872_v37 }
 0x1ee   : > { %v2995_v45 = vpop.f32.mrb[20].mxu0 }
 0x1ef   : > { %v2997_v58 = vpop.f32.mrb[21].mxu0 }
 0x1f0   : > { %v2999_v38 = vpop.f32.mrb[22].mxu0 }
 0x1f1   : > { %v3001_v27 = vpop.f32.mrb[23].mxu0 }
 0x1f6   : > { %v3003_v3 = vpop.f32.mrb[24].mxu0 }
 0x1f7   : > { %v3005_v4 = vpop.f32.mrb[25].mxu0 }
 0x1f8   : > { %v3007_v39 = vpop.f32.mrb[26].mxu0 }
 0x1f9   : > { %v3009_v8 = vpop.f32.mrb[27].mxu0 }
 0x1fe   : > { %v3011_v59 = vpop.f32.mrb[28].mxu0 }
 0x1ff   : > { %v3013_v40 = vpop.f32.mrb[29].mxu0 }
 0x200   : > { %v3015_v11 = vpop.f32.mrb[30].mxu0 }
 0x201   : > { %v3017_v60 = vpop.f32.mrb[31].mxu0 }
 0x206   : > { %v3019_v46 = vpop.f32.mrb[32].mxu0 }
 0x207   : > { %v3021_v5 = vpop.f32.mrb[33].mxu0 }
 0x208   : > { %v3023_v47 = vpop.f32.mrb[34].mxu0 }
 0x209   : > { %v3025_v14 = vpop.f32.mrb[35].mxu0 }
 0x20e   : > { %v1557_v15 = vpop.f32.mrb[40].mxu0 }
 0x20f   : > { %v3028_v61 = vadd.f32 %v1557_v15, %v2957_v31  ;;  %v1559_v48 = vpop.f32.mrb[41].mxu0  ;;  %v1783_v31 = vld [vmem:[%s3199_s7] sm:$0x3] }
 0x210   : > { %v3031_v62 = vadd.f32 %v1559_v48, %v2959_v42  ;;  %v1561_v16 = vpop.f32.mrb[42].mxu0  ;;  %v3047_v41 = vrot.slane %v1783_v31, %v2858_v7  ;;  %v3051_v50 = vrot.slane %v1783_v31, %v2866_v10 }
 0x211   : > { %v1562_v63 = vpop.f32.mrb[43].mxu0 }
 0x216   : > { %v1598_v0 = vpop.f32.mrb[0].mxu0 }
 0x217   : > { %v1707_v42 = vadd.f32 %v3037_v49, %v1598_v0  ;;  %v1600_v19 = vpop.f32.mrb[1].mxu0 }
 0x218   : > { %v1708_v20 = vadd.f32 %v3040_v18, %v1600_v19  ;;  %v1602_v21 = vpop.f32.mrb[2].mxu0 }
 0x219   : > { %v1745_v22 = vmax.f32 %v1707_v42, 0.0  ;;  %v1709_v1 = vadd.f32 %v3037_v49, %v1602_v21  ;;  %v1604_v51 = vpop.f32.mrb[3].mxu0 }
 0x21a   : > { %v1746_v2 = vmax.f32 %v1708_v20, 0.0  ;;  %v1710_v23 = vadd.f32 %v3040_v18, %v1604_v51 }
 0x21b   : > { %v1747_v52 = vmax.f32 %v1709_v1, 0.0  ;;  %v1795_v12 = vmul.f32 %v3047_v41, %v1745_v22 }
 0x21c   : > { %v1748_v24 = vmax.f32 %v1710_v23, 0.0  ;;  %v1796_v7 = vmul.f32 %v3051_v50, %v1746_v2 }
 0x21d   : > { %v1797_v13 = vmul.f32 %v3047_v41, %v1747_v52 }
 0x21e   : > { %v1798_v25 = vmul.f32 %v3051_v50, %v1748_v24  ;;  %v1608_v53 = vpop.f32.mrb[4].mxu0  ;;  %v1833_v10 = vadd.f32 %v1796_v7, %v1795_v12 }
 0x21f   : > { %v1711_v6 = vadd.f32 %v3037_v49, %v1608_v53  ;;  %v1610_v36 = vpop.f32.mrb[5].mxu0 }
 0x220   : > { %v1712_v26 = vadd.f32 %v3040_v18, %v1610_v36  ;;  %1834 = vadd.xlane.f32.xlu0 %v1833_v10  ;;  %v1612_v28 = vpop.f32.mrb[6].mxu0  ;;  %v1836_v29 = vadd.f32 %v1798_v25, %v1797_v13 }
 0x221   : > { %v1749_v30 = vmax.f32 %v1711_v6, 0.0  ;;  %v1713_v54 = vadd.f32 %v3037_v49, %v1612_v28  ;;  %v1614_v9 = vpop.f32.mrb[7].mxu0 }
 0x222   : > { %v1750_v55 = vmax.f32 %v1712_v26, 0.0  ;;  %v1714_v32 = vadd.f32 %v3040_v18, %v1614_v9 }
 0x223   : > { %v1751_v56 = vmax.f32 %v1713_v54, 0.0  ;;  %v1799_v43 = vmul.f32 %v3047_v41, %v1749_v30 }
 0x224   : > { %v1752_v33 = vmax.f32 %v1714_v32, 0.0  ;;  %1837 = vadd.xlane.f32.xlu0 %v1836_v29  ;;  %v1800_v57 = vmul.f32 %v3051_v50, %v1750_v55 }
 0x225   : > { %v1801_v34 = vmul.f32 %v3047_v41, %v1751_v56 }
 0x226   : > { %v1802_v44 = vmul.f32 %v3051_v50, %v1752_v33  ;;  %v1618_v35 = vpop.f32.mrb[8].mxu0  ;;  %v1839_v37 = vadd.f32 %v1800_v57, %v1799_v43 }
 0x227   : > { %v1715_v15 = vadd.f32 %v3037_v49, %v1618_v35  ;;  %v1620_v48 = vpop.f32.mrb[9].mxu0 }
 0x228   : > { %v1716_v16 = vadd.f32 %v3040_v18, %v1620_v48  ;;  %1840 = vadd.xlane.f32.xlu1 %v1839_v37  ;;  %v1622_v17 = vpop.f32.mrb[10].mxu0  ;;  %v1842_v63 = vadd.f32 %v1802_v44, %v1801_v34 }
 0x229   : > { %v1753_v31 = vmax.f32 %v1715_v15, 0.0  ;;  %v1717_v0 = vadd.f32 %v3037_v49, %v1622_v17  ;;  %v1624_v42 = vpop.f32.mrb[11].mxu0 }
 0x22a   : > { %v1754_v19 = vmax.f32 %v1716_v16, 0.0  ;;  %v1718_v20 = vadd.f32 %v3040_v18, %v1624_v42 }
 0x22b   : > { %v1803_v21 = vmul.f32 %v3047_v41, %v1753_v31  ;;  %v1755_v22 = vmax.f32 %v1717_v0, 0.0 }
 0x22c   : > { %v1804_v1 = vmul.f32 %v3051_v50, %v1754_v19  ;;  %v1756_v51 = vmax.f32 %v1718_v20, 0.0  ;;  %1843 = vadd.xlane.f32.xlu1 %v1842_v63 }
 0x22d   : > { %v1805_v2 = vmul.f32 %v3047_v41, %v1755_v22 }
 0x22e   : > { %v1806_v23 = vmul.f32 %v3051_v50, %v1756_v51  ;;  %v1628_v52 = vpop.f32.mrb[12].mxu0  ;;  %v1845_v12 = vadd.f32 %v1804_v1, %v1803_v21 }
 0x22f   : > { %v1719_v24 = vadd.f32 %v3037_v49, %v1628_v52  ;;  %v1630_v7 = vpop.f32.mrb[13].mxu0 }
 0x230   : > { %v1720_v13 = vadd.f32 %v3040_v18, %v1630_v7  ;;  %1846 = vadd.xlane.f32.xlu0 %v1845_v12  ;;  %v1632_v25 = vpop.f32.mrb[14].mxu0  ;;  %v1848_v53 = vadd.f32 %v1806_v23, %v1805_v2 }
 0x231   : > { %v1757_v10 = vmax.f32 %v1719_v24, 0.0  ;;  %v1721_v6 = vadd.f32 %v3037_v49, %v1632_v25  ;;  %v1634_v36 = vpop.f32.mrb[15].mxu0 }
 0x232   : > { %v1758_v26 = vmax.f32 %v1720_v13, 0.0  ;;  %v1722_v28 = vadd.f32 %v3040_v18, %v1634_v36  ;;  %1849 = vadd.xlane.f32.xlu1 %v1848_v53 }
 0x233   : > { %v1807_v29 = vmul.f32 %v3047_v41, %v1757_v10  ;;  %v1759_v30 = vmax.f32 %v1721_v6, 0.0 }
 0x234   : > { %v1808_v54 = vmul.f32 %v3051_v50, %v1758_v26  ;;  %v1760_v9 = vmax.f32 %v1722_v28, 0.0 }
 0x235   : > { %v1809_v55 = vmul.f32 %v3047_v41, %v1759_v30 }
 0x236   : > { %v1810_v32 = vmul.f32 %v3051_v50, %v1760_v9  ;;  %v1638_v56 = vpop.f32.mrb[16].mxu0  ;;  %v1851_v43 = vadd.f32 %v1808_v54, %v1807_v29 }
 0x237   : > { %v1723_v33 = vadd.f32 %v3037_v49, %v1638_v56  ;;  %v1640_v57 = vpop.f32.mrb[17].mxu0 }
 0x238   : > { %v1724_v34 = vadd.f32 %v3040_v18, %v1640_v57  ;;  %1852 = vadd.xlane.f32.xlu0 %v1851_v43  ;;  %v1642_v44 = vpop.f32.mrb[18].mxu0  ;;  %v1854_v35 = vadd.f32 %v1810_v32, %v1809_v55 }
 0x239   : > { %v1761_v37 = vmax.f32 %v1723_v33, 0.0  ;;  %v1725_v15 = vadd.f32 %v3037_v49, %v1642_v44  ;;  %v1644_v48 = vpop.f32.mrb[19].mxu0 }
 0x23a   : > { %v1762_v16 = vmax.f32 %v1724_v34, 0.0  ;;  %v1726_v17 = vadd.f32 %v3040_v18, %v1644_v48  ;;  %1855 = vadd.xlane.f32.xlu1 %v1854_v35 }
 0x23b   : > { %v1811_v63 = vmul.f32 %v3047_v41, %v1761_v37  ;;  %v1763_v31 = vmax.f32 %v1725_v15, 0.0 }
 0x23c   : > { %v1812_v0 = vmul.f32 %v3051_v50, %v1762_v16  ;;  %v1764_v42 = vmax.f32 %v1726_v17, 0.0 }
 0x23d   : > { %v1813_v19 = vmul.f32 %v3047_v41, %v1763_v31 }
 0x23e   : > { %v1814_v20 = vmul.f32 %v3051_v50, %v1764_v42  ;;  %v1648_v21 = vpop.f32.mrb[80].mxu1  ;;  %v1857_v22 = vadd.f32 %v1812_v0, %v1811_v63 }
 0x23f   : > { %v2148_v1 = vadd.f32 %v1648_v21, %v2995_v45  ;;  %v1650_v51 = vpop.f32.mrb[81].mxu1 }
 0x240   : > { %v2149_v2 = vadd.f32 %v1650_v51, %v2997_v58  ;;  %v1652_v23 = vpop.f32.mrb[82].mxu1  ;;  %1858 = vadd.xlane.f32.xlu0 %v1857_v22  ;;  %v1860_v52 = vadd.f32 %v1814_v20, %v1813_v19 }
 0x241   : > { %v1727_v12 = vadd.f32 %v2148_v1, %v3037_v49  ;;  %v2150_v24 = vadd.f32 %v1652_v23, %v2999_v38  ;;  %v1654_v7 = vpop.f32.mrb[83].mxu1 }
 0x242   : > { %v1728_v13 = vadd.f32 %v2149_v2, %v3040_v18  ;;  %v2151_v25 = vadd.f32 %v1654_v7, %v3001_v27  ;;  %1861 = vadd.xlane.f32.xlu1 %v1860_v52 }
 0x243   : > { %v1765_v53 = vmax.f32 %v1727_v12, 0.0  ;;  %v1729_v10 = vadd.f32 %v2150_v24, %v3037_v49 }
 0x244   : > { %v1766_v45 = vmax.f32 %v1728_v13, 0.0  ;;  %v1730_v6 = vadd.f32 %v2151_v25, %v3040_v18 }
 0x245   : > { %v1767_v58 = vmax.f32 %v1729_v10, 0.0  ;;  %v1815_v36 = vmul.f32 %v3047_v41, %v1765_v53 }
 0x246   : > { %v1768_v26 = vmax.f32 %v1730_v6, 0.0  ;;  %v1658_v28 = vpop.f32.mrb[84].mxu1  ;;  %v1816_v29 = vmul.f32 %v3051_v50, %v1766_v45 }
 0x247   : > { %v2152_v38 = vadd.f32 %v1658_v28, %v3003_v3  ;;  %v1660_v30 = vpop.f32.mrb[85].mxu1  ;;  %v1817_v54 = vmul.f32 %v3047_v41, %v1767_v58 }
 0x248   : > { %v2153_v27 = vadd.f32 %v1660_v30, %v3005_v4  ;;  %v1662_v9 = vpop.f32.mrb[86].mxu1  ;;  %v1863_v55 = vadd.f32 %v1816_v29, %v1815_v36  ;;  %v1818_v32 = vmul.f32 %v3051_v50, %v1768_v26 }
 0x249   : > { %v1731_v56 = vadd.f32 %v2152_v38, %v3037_v49  ;;  %v2154_v43 = vadd.f32 %v1662_v9, %v3007_v39  ;;  %v1664_v33 = vpop.f32.mrb[87].mxu1 }
 0x24a   : > { %v1732_v57 = vadd.f32 %v2153_v27, %v3040_v18  ;;  %v2155_v34 = vadd.f32 %v1664_v33, %v3009_v8  ;;  %1864 = vadd.xlane.f32.xlu0 %v1863_v55  ;;  %v1866_v3 = vadd.f32 %v1818_v32, %v1817_v54 }
 0x24b   : > { %v1769_v44 = vmax.f32 %v1731_v56, 0.0  ;;  %v1733_v35 = vadd.f32 %v2154_v43, %v3037_v49 }
 0x24c   : > { %v1770_v37 = vmax.f32 %v1732_v57, 0.0  ;;  %v1734_v4 = vadd.f32 %v2155_v34, %v3040_v18  ;;  %1867 = vadd.xlane.f32.xlu1 %v1866_v3 }
 0x24d   : > { %v1771_v15 = vmax.f32 %v1733_v35, 0.0  ;;  %v1819_v48 = vmul.f32 %v3047_v41, %v1769_v44 }
 0x24e   : > { %v1772_v16 = vmax.f32 %v1734_v4, 0.0  ;;  %v1668_v17 = vpop.f32.mrb[88].mxu1  ;;  %v1820_v39 = vmul.f32 %v3051_v50, %v1770_v37 }
 0x24f   : > { %v2156_v63 = vadd.f32 %v1668_v17, %v3011_v59  ;;  %v1670_v31 = vpop.f32.mrb[89].mxu1  ;;  %v1821_v8 = vmul.f32 %v3047_v41, %v1771_v15 }
 0x250   : > { %v2157_v0 = vadd.f32 %v1670_v31, %v3013_v40  ;;  %v1672_v42 = vpop.f32.mrb[90].mxu1  ;;  %v1869_v19 = vadd.f32 %v1820_v39, %v1819_v48  ;;  %v1822_v20 = vmul.f32 %v3051_v50, %v1772_v16 }
 0x251   : > { %v1735_v21 = vadd.f32 %v2156_v63, %v3037_v49  ;;  %v2158_v22 = vadd.f32 %v1672_v42, %v3015_v11  ;;  %v1674_v1 = vpop.f32.mrb[91].mxu1  ;;  %v2113_v63 = vld [vmem:[#allocation2] ss:$0 sm:$0xff] }
 0x252   : > { %v1736_v51 = vadd.f32 %v2157_v0, %v3040_v18  ;;  %v2159_v2 = vadd.f32 %v1674_v1, %v3017_v60  ;;  %1870 = vadd.xlane.f32.xlu0 %v1869_v19  ;;  %v1872_v59 = vadd.f32 %v1822_v20, %v1821_v8 }
 0x253   : > { %v1773_v23 = vmax.f32 %v1735_v21, 0.0  ;;  %v1737_v52 = vadd.f32 %v2158_v22, %v3037_v49 }
 0x254   : > { %v1774_v12 = vmax.f32 %v1736_v51, 0.0  ;;  %v1738_v40 = vadd.f32 %v2159_v2, %v3040_v18  ;;  %1873 = vadd.xlane.f32.xlu1 %v1872_v59 }
 0x255   : > { %v1775_v24 = vmax.f32 %v1737_v52, 0.0  ;;  %v1823_v7 = vmul.f32 %v3047_v41, %v1773_v23 }
 0x256   : > { %v1776_v13 = vmax.f32 %v1738_v40, 0.0  ;;  %v1678_v25 = vpop.f32.mrb[92].mxu1  ;;  %v1824_v11 = vmul.f32 %v3051_v50, %v1774_v12 }
 0x257   : > { %v2160_v53 = vadd.f32 %v1678_v25, %v3019_v46  ;;  %v1680_v10 = vpop.f32.mrb[93].mxu1  ;;  %v1825_v60 = vmul.f32 %v3047_v41, %v1775_v24 }
 0x258   : > { %v2161_v45 = vadd.f32 %v1680_v10, %v3021_v5  ;;  %v1682_v6 = vpop.f32.mrb[94].mxu1  ;;  %v1875_v58 = vadd.f32 %v1824_v11, %v1823_v7  ;;  %v1826_v36 = vmul.f32 %v3051_v50, %v1776_v13 }
 0x259   : > { %v1739_v26 = vadd.f32 %v2160_v53, %v3037_v49  ;;  %v2162_v28 = vadd.f32 %v1682_v6, %v3023_v47  ;;  %v1684_v29 = vpop.f32.mrb[95].mxu1 }
 0x25a   : > { %v1740_v38 = vadd.f32 %v2161_v45, %v3040_v18  ;;  %v2163_v30 = vadd.f32 %v1684_v29, %v3025_v14  ;;  %1876 = vadd.xlane.f32.xlu0 %v1875_v58  ;;  %v1878_v46 = vadd.f32 %v1826_v36, %v1825_v60 }
 0x25b   : > { %v1777_v54 = vmax.f32 %v1739_v26, 0.0  ;;  %v1741_v27 = vadd.f32 %v2162_v28, %v3037_v49 }
 0x25c   : > { %v1778_v9 = vmax.f32 %v1740_v38, 0.0  ;;  %v1742_v5 = vadd.f32 %v2163_v30, %v3040_v18  ;;  %1879 = vadd.xlane.f32.xlu1 %v1878_v46 }
 0x25d   : > { %v1779_v55 = vmax.f32 %v1741_v27, 0.0  ;;  %v1827_v32 = vmul.f32 %v3047_v41, %v1777_v54 }
 0x25e   : > { %v1780_v56 = vmax.f32 %v1742_v5, 0.0  ;;  %v1688_v43 = vpop.f32.mrb[96].mxu1  ;;  %v1828_v47 = vmul.f32 %v3051_v50, %v1778_v9 }
 0x25f   : > { %v1689_v33 = vadd.f32 %v1688_v43, %v3028_v61  ;;  %v1690_v57 = vpop.f32.mrb[97].mxu1  ;;  %v1829_v14 = vmul.f32 %v3047_v41, %v1779_v55 }
 0x260   : > { %v1691_v34 = vadd.f32 %v1690_v57, %v3031_v62  ;;  %v1692_v3 = vpop.f32.mrb[98].mxu1  ;;  %v1881_v44 = vadd.f32 %v1828_v47, %v1827_v32  ;;  %v1830_v35 = vmul.f32 %v3051_v50, %v1780_v56 }
 0x261   : > { %v1743_v37 = vadd.f32 %v3037_v49, %v1689_v33  ;;  %v1693_v4 = vpop.f32.mrb[99].mxu1 }
 0x262   : > { %v1744_v15 = vadd.f32 %v3040_v18, %v1691_v34  ;;  %1882 = vadd.xlane.f32.xlu0 %v1881_v44  ;;  %v1884_v48 = vadd.f32 %v1830_v35, %v1829_v14 }
 0x263   : > { %v1781_v16 = vmax.f32 %v1743_v37, 0.0 }
 0x264   : > { %v1782_v17 = vmax.f32 %v1744_v15, 0.0  ;;  %1885 = vadd.xlane.f32.xlu1 %v1884_v48 }
 0x265   : > { %v1831_v61 = vmul.f32 %v3047_v41, %v1781_v16 }
 0x266   : > { %v1832_v39 = vmul.f32 %v3051_v50, %v1782_v17 }
 0x268   : > { %v1887_v62 = vadd.f32 %v1832_v39, %v1831_v61 }
 0x26a   : > { %1888 = vadd.xlane.f32.xlu0 %v1887_v62 }
 0x2ad   : > { %v1835_v49 = vpop.xlane.xlu0 %1834 }
 0x2ae   : > { %v1897_v18 = vadd.f32 %v2113_v63, %v1835_v49 }
 0x2b0   : > { %1917 = vst.msk [vmem:[%s3149_s10] sm:$0xff] %vm1916_vm3, %v1897_v18 }
 0x2b1   : > { %v1838_v41 = vpop.xlane.xlu0 %1837 }
 0x2b2   : > { %v1898_v50 = vadd.f32 %v2113_v63, %v1838_v41 }
 0x2b4   : > { %1918 = vst.msk [vmem:[%s3149_s10 + $0x8] sm:$0xff] %vm1916_vm3, %v1898_v50 }
 0x2b5   : > { %v1841_v31 = vpop.xlane.xlu1 %1840 }
 0x2b6   : > { %v1899_v8 = vadd.f32 %v2113_v63, %v1841_v31 }
 0x2b8   : > { %1919 = vst.msk [vmem:[%s3149_s10 + $0x10] sm:$0xff] %vm1916_vm3, %v1899_v8 }
 0x2b9   : > { %v1844_v0 = vpop.xlane.xlu1 %1843 }
 0x2ba   : > { %v1900_v42 = vadd.f32 %v2113_v63, %v1844_v0 }
 0x2bc   : > { %1920 = vst.msk [vmem:[%s3149_s10 + $0x18] sm:$0xff] %vm1916_vm3, %v1900_v42 }
 0x2bd   : > { %v1847_v19 = vpop.xlane.xlu0 %1846 }
 0x2be   : > { %v1901_v20 = vadd.f32 %v2113_v63, %v1847_v19 }
 0x2bf   : > { %v1850_v21 = vpop.xlane.xlu1 %1849 }
 0x2c0   : > { %1921 = vst.msk [vmem:[%s3149_s10 + $0x20] sm:$0xff] %vm1916_vm3, %v1901_v20  ;;  %v1902_v22 = vadd.f32 %v2113_v63, %v1850_v21 }
 0x2c2   : > { %1922 = vst.msk [vmem:[%s3149_s10 + $0x28] sm:$0xff] %vm1916_vm3, %v1902_v22 }
 0x2c5   : > { %v1853_v1 = vpop.xlane.xlu0 %1852 }
 0x2c6   : > { %v1903_v51 = vadd.f32 %v2113_v63, %v1853_v1 }
 0x2c7   : > { %v1856_v2 = vpop.xlane.xlu1 %1855 }
 0x2c8   : > { %1923 = vst.msk [vmem:[%s3149_s10 + $0x30] sm:$0xff] %vm1916_vm3, %v1903_v51  ;;  %v1904_v59 = vadd.f32 %v2113_v63, %v1856_v2 }
 0x2ca   : > { %1924 = vst.msk [vmem:[%s3149_s10 + $0x38] sm:$0xff] %vm1916_vm3, %v1904_v59 }
 0x2cd   : > { %v1859_v23 = vpop.xlane.xlu0 %1858 }
 0x2ce   : > { %v1905_v52 = vadd.f32 %v2113_v63, %v1859_v23 }
 0x2cf   : > { %v1862_v12 = vpop.xlane.xlu1 %1861 }
 0x2d0   : > { %1925 = vst.msk [vmem:[%s3149_s10 + $0x40] sm:$0xff] %vm1916_vm3, %v1905_v52  ;;  %v1906_v40 = vadd.f32 %v2113_v63, %v1862_v12 }
 0x2d2   : > { %1926 = vst.msk [vmem:[%s3149_s10 + $0x48] sm:$0xff] %vm1916_vm3, %v1906_v40 }
 0x2d7   : > { %v1865_v24 = vpop.xlane.xlu0 %1864 }
 0x2d8   : > { %v1907_v7 = vadd.f32 %v2113_v63, %v1865_v24 }
 0x2d9   : > { %v1868_v13 = vpop.xlane.xlu1 %1867 }
 0x2da   : > { %1927 = vst.msk [vmem:[%s3149_s10 + $0x50] sm:$0xff] %vm1916_vm3, %v1907_v7  ;;  %v1908_v25 = vadd.f32 %v2113_v63, %v1868_v13 }
 0x2dc   : > { %1928 = vst.msk [vmem:[%s3149_s10 + $0x58] sm:$0xff] %vm1916_vm3, %v1908_v25 }
 0x2df   : > { %v1871_v11 = vpop.xlane.xlu0 %1870 }
 0x2e0   : > { %v1909_v53 = vadd.f32 %v2113_v63, %v1871_v11 }
 0x2e1   : > { %v1874_v10 = vpop.xlane.xlu1 %1873 }
 0x2e2   : > { %1929 = vst.msk [vmem:[%s3149_s10 + $0x60] sm:$0xff] %vm1916_vm3, %v1909_v53  ;;  %v1910_v60 = vadd.f32 %v2113_v63, %v1874_v10 }
 0x2e4   : > { %1930 = vst.msk [vmem:[%s3149_s10 + $0x68] sm:$0xff] %vm1916_vm3, %v1910_v60 }
 0x2e7   : > { %v1877_v45 = vpop.xlane.xlu0 %1876 }
 0x2e8   : > { %v1911_v6 = vadd.f32 %v2113_v63, %v1877_v45 }
 0x2e9   : > { %v1880_v58 = vpop.xlane.xlu1 %1879 }
 0x2ea   : > { %1931 = vst.msk [vmem:[%s3149_s10 + $0x70] sm:$0xff] %vm1916_vm3, %v1911_v6  ;;  %v1912_v36 = vadd.f32 %v2113_v63, %v1880_v58 }
 0x2ec   : > { %1932 = vst.msk [vmem:[%s3149_s10 + $0x78] sm:$0xff] %vm1916_vm3, %v1912_v36 }
 0x2ef   : > { %v1883_v26 = vpop.xlane.xlu0 %1882 }
 0x2f0   : > { %v1913_v28 = vadd.f32 %v2113_v63, %v1883_v26 }
 0x2f1   : > { %v1886_v29 = vpop.xlane.xlu1 %1885 }
 0x2f2   : > { %1933 = vst.msk [vmem:[%s3149_s10 + $0x80] sm:$0xff] %vm1916_vm3, %v1913_v28  ;;  %v1914_v38 = vadd.f32 %v2113_v63, %v1886_v29 }
 0x2f4   : > { %1934 = vst.msk [vmem:[%s3149_s10 + $0x88] sm:$0xff] %vm1916_vm3, %v1914_v38 }
 0x2f7   : > { %v1889_v30 = vpop.xlane.xlu0 %1888 }
 0x2f8   : > { %v1915_v46 = vadd.f32 %v2113_v63, %v1889_v30 }
 0x2fa   : > { %1935 = vst.msk [vmem:[%s3149_s10 + $0x90] sm:$0xff] %vm1916_vm3, %v1915_v46 }
 0x2fb PF: > { %s21_s11 = sadd.s32 1, %s2339_s11  }
 0x2fc   : > { %p18_p4 = scmp.ge.s32.totalorder %s21_s11, 4  }
 0x2fe   :  { %20 = sbr.rel (!%p18_p4) target bundleno = 3 (0x3), region = 89 }

</bundles_post_ra>
